<compile_context>
chip_gen: v7x
topology: tpu7x:2x2x1
jax: 0.10.0
libtpu: 0.0.40
codegen_flags: <defaults>
</compile_context>

<pallas_src>
import math
from functools import partial

import jax
import jax.numpy as jnp
from jax import lax
from jax.experimental import pallas as pl
from jax.experimental.pallas import tpu as pltpu

_PAD = 8  # sublane-aligned left padding inside the conv scratch buffer


# ----------------------------- fused kernel -----------------------------

def _encoder_kernel(data_ref,
                    ln1_g_ref, ln1_b_ref, ln2_g_ref, ln2_b_ref,
                    kl3_w_ref, kl5_w_ref, kl_b_ref,
                    qgv_w_ref, qgv_b_ref,
                    wo_w_ref, wo_b_ref,
                    ff1_w_ref, ff1_b_ref, ff2_w_ref, ff2_b_ref,
                    o_ref,
                    xp_ref,
                    *, num_heads, scale):
    x = data_ref[0]                       # (S, D) f32, one batch element
    S, D = x.shape
    H = num_heads
    dk = D // H

    def layernorm(v, g_ref, b_ref):       # f32 elementwise (v5e-safe)
        mean = jnp.mean(v, axis=-1, keepdims=True)
        var = jnp.mean(jnp.square(v - mean), axis=-1, keepdims=True)
        return (v - mean) * lax.rsqrt(var + 1e-5) * g_ref[...] + b_ref[...]

    def mm(a_f32, w_bf16):                # bf16 MXU operands, f32 accumulate
        return jnp.dot(a_f32.astype(jnp.bfloat16), w_bf16,
                       preferred_element_type=jnp.float32)

    # -------- LayerNorm 1 --------
    res = layernorm(x, ln1_g_ref, ln1_b_ref)                    # (S, D)

    # -------- MultiScaleConv1d + BN(eval) + w_k_local (all folded) --------
    # In-kernel im2col: zero-padded scratch + static shifted-slice reads.
    xp_ref[...] = jnp.zeros(xp_ref.shape, jnp.float32)
    xp_ref[pl.ds(_PAD, S), :] = res

    def conv_matmul(ksz, pad, w_ref):
        acc = jnp.zeros((S, D), jnp.float32)
        for j in range(ksz):                                    # unrolled
            tap = xp_ref[pl.ds(_PAD + j - pad, S), :]           # (S, D)
            acc = acc + mm(tap, w_ref[pl.ds(j * D, D), :])
        return acc

    k_local = (conv_matmul(3, 1, kl3_w_ref)
               + conv_matmul(5, 2, kl5_w_ref)
               + kl_b_ref[...])                                 # (S, D)

    # -------- fused Q / K_global / V projection --------
    qgv = mm(res, qgv_w_ref[...]) + qgv_b_ref[...]              # (S, 3D)

    # -------- dual (local + global) attention, heads sliced in-register -----
    qgv_b16 = qgv.astype(jnp.bfloat16)
    kl_b16 = k_local.astype(jnp.bfloat16)
    out_attn = jnp.zeros((S, D), jnp.float32)
    for h in range(H):                                          # unrolled
        lo = h * dk
        qh = qgv_b16[:, lo:lo + dk]
        kgh = qgv_b16[:, D + lo:D + lo + dk]
        vh = qgv_b16[:, 2 * D + lo:2 * D + lo + dk]
        klh = kl_b16[:, lo:lo + dk]

        def attend(kh):
            s = lax.dot_general(qh, kh, (((1,), (1,)), ((), ())),
                                preferred_element_type=jnp.float32) * scale
            s = s - jnp.max(s, axis=-1, keepdims=True)          # f32 softmax
            p = jnp.exp(s)
            p = p * pl.reciprocal(jnp.sum(p, axis=-1, keepdims=True),
                                  approx=True)
            return jnp.dot(p.astype(jnp.bfloat16), vh,
                           preferred_element_type=jnp.float32)

        head = attend(klh) + attend(kgh)                        # (S, dk)
        # Fold the head back through its slice of W_o (no lane concat needed).
        out_attn = out_attn + mm(head, wo_w_ref[pl.ds(lo, dk), :])

    out1 = x + out_attn + wo_b_ref[...]                         # residual 1

    # -------- LayerNorm 2 + FeedForward (hidden stays in VMEM) --------
    res2 = layernorm(out1, ln2_g_ref, ln2_b_ref)
    hid = mm(res2, ff1_w_ref[...]) + ff1_b_ref[...]             # (S, D*ratio)
    # TODO(synk): GroupKANLinear's definition was not provided; it is modeled
    # as a plain dense linear.  The reference FeedForward code has no explicit
    # activation between w_1 and w_2, so none is applied here.
    ff = mm(hid, ff2_w_ref[...]) + ff2_b_ref[...]               # (S, D)

    o_ref[0] = out1 + ff                                        # residual 2


_WEIGHT_KEYS = ('ln1_g', 'ln1_b', 'ln2_g', 'ln2_b',
                'kl3_w', 'kl5_w', 'kl_b',
                'qgv_w', 'qgv_b',
                'wo_w', 'wo_b',
                'ff1_w', 'ff1_b', 'ff2_w', 'ff2_b')


def transformer_encoder(fused, data, num_heads):
    """data: (B, S, D) f32 -> (B, S, D) f32. Whole encoder layer, 1 kernel."""
    B, S, D = data.shape
    assert D % num_heads == 0
    dk = D // num_heads
    weights = [fused[k] for k in _WEIGHT_KEYS]

    kernel = partial(_encoder_kernel, num_heads=num_heads,
                     scale=1.0 / math.sqrt(dk))

    in_specs = [pl.BlockSpec((1, S, D), lambda b: (b, 0, 0))]
    in_specs += [pl.BlockSpec(w.shape, lambda b: (0, 0)) for w in weights]

    return pl.pallas_call(
        kernel,
        out_shape=jax.ShapeDtypeStruct((B, S, D), jnp.float32),
        grid=(B,),
        in_specs=in_specs,
        out_specs=pl.BlockSpec((1, S, D), lambda b: (b, 0, 0)),
        scratch_shapes=[pltpu.VMEM((S + 2 * _PAD, D), jnp.float32)],
        compiler_params=pltpu.CompilerParams(
            dimension_semantics=("parallel",),        # shards over v7x's 2 TCs
            vmem_limit_bytes=32 * 1024 * 1024),       # safe on v5e/v6e/v7x
    )(data, *weights)


# ------------------------- deterministic init / folding -------------------------

def init_params(key, embed_dim, fc_ratio):
    """Torch-equivalent parameters (Conv1d/BN in torch layout, BN pre-folded
    into the conv im2col weights as in eval mode)."""
    D = embed_dim
    d_hidden = D * fc_ratio
    kernel_sizes = (3, 5)
    keys = iter(jax.random.split(key, 16))

    def lin(k, fan_in, fan_out):
        kw, kb = jax.random.split(k)
        lim = 1.0 / math.sqrt(fan_in)
        w = jax.random.uniform(kw, (fan_in, fan_out), jnp.float32, -lim, lim)
        b = jax.random.uniform(kb, (1, fan_out), jnp.float32, -lim, lim)
        return w, b

    p = {}
    p['ln1_g'] = jnp.ones((1, D), jnp.float32)
    p['ln1_b'] = jnp.zeros((1, D), jnp.float32)
    p['ln2_g'] = jnp.ones((1, D), jnp.float32)
    p['ln2_b'] = jnp.zeros((1, D), jnp.float32)

    conv_w, conv_b = [], []
    for ksz in kernel_sizes:                        # torch layout (out, in, k)
        kw, kb = jax.random.split(next(keys))
        lim = 1.0 / math.sqrt(D * ksz)
        conv_w.append(jax.random.uniform(kw, (D, D, ksz), jnp.float32, -lim, lim))
        conv_b.append(jax.random.uniform(kb, (D,), jnp.float32, -lim, lim))

    # BatchNorm1d(2D) in eval mode: per-channel affine, folded into conv.
    C = D * len(kernel_sizes)
    kg, kbn, km, kv = jax.random.split(next(keys), 4)
    bn_gamma = 1.0 + 0.1 * jax.random.normal(kg, (C,), jnp.float32)
    bn_beta = 0.1 * jax.random.normal(kbn, (C,), jnp.float32)
    bn_mean = 0.1 * jax.random.normal(km, (C,), jnp.float32)
    bn_var = 1.0 + 0.05 * jnp.abs(jax.random.normal(kv, (C,), jnp.float32))
    bn_scale = bn_gamma / jnp.sqrt(bn_var + 1e-5)
    bn_shift = bn_beta - bn_mean * bn_scale

    for i, ksz in enumerate(kernel_sizes):
        sl = slice(i * D, (i + 1) * D)
        scale, shift = bn_scale[sl], bn_shift[sl]
        # im2col layout: W_col[j*D + c, o] = W_torch[o, c, j]
        W_col = jnp.transpose(conv_w[i], (2, 1, 0)).reshape(ksz * D, D)
        p[f'conv{ksz}_w'] = W_col * scale[None, :]
        p[f'conv{ksz}_b'] = (conv_b[i] * scale + shift)[None, :]

    # TODO(synk): GroupKANLinear definition not provided; modeled as dense.
    p['wq_w'], p['wq_b'] = lin(next(keys), D, D)
    p['wkl_w'], p['wkl_b'] = lin(next(keys), D * len(kernel_sizes), D)
    p['wkg_w'], p['wkg_b'] = lin(next(keys), D, D)
    p['wv_w'], p['wv_b'] = lin(next(keys), D, D)
    p['wo_w'], p['wo_b'] = lin(next(keys), D, D)
    p['ff1_w'], p['ff1_b'] = lin(next(keys), D, d_hidden)
    p['ff2_w'], p['ff2_b'] = lin(next(keys), d_hidden, D)
    return p


def fuse_params(p, embed_dim):
    """Fold conv(+BN) into w_k_local, concat Q/Kg/V weights, cast matmul
    weights to bf16 (biases & LN params stay f32)."""
    D = embed_dim
    wkl_top = p['wkl_w'][:D, :]
    wkl_bot = p['wkl_w'][D:, :]
    return {
        'ln1_g': p['ln1_g'], 'ln1_b': p['ln1_b'],
        'ln2_g': p['ln2_g'], 'ln2_b': p['ln2_b'],
        'kl3_w': (p['conv3_w'] @ wkl_top).astype(jnp.bfloat16),
        'kl5_w': (p['conv5_w'] @ wkl_bot).astype(jnp.bfloat16),
        'kl_b': p['conv3_b'] @ wkl_top + p['conv5_b'] @ wkl_bot + p['wkl_b'],
        'qgv_w': jnp.concatenate([p['wq_w'], p['wkg_w'], p['wv_w']],
                                 axis=1).astype(jnp.bfloat16),
        'qgv_b': jnp.concatenate([p['wq_b'], p['wkg_b'], p['wv_b']], axis=1),
        'wo_w': p['wo_w'].astype(jnp.bfloat16), 'wo_b': p['wo_b'],
        'ff1_w': p['ff1_w'].astype(jnp.bfloat16), 'ff1_b': p['ff1_b'],
        'ff2_w': p['ff2_w'].astype(jnp.bfloat16), 'ff2_b': p['ff2_b'],
    }


# ----------------------------- pure-JAX reference -----------------------------

def reference_forward(p, data, num_heads):
    """f32, unfused, mirrors the torch module (eval mode)."""
    B, S, D = data.shape
    H = num_heads
    dk = D // H

    def ln(x, g, b):
        m = jnp.mean(x, axis=-1, keepdims=True)
        v = jnp.mean(jnp.square(x - m), axis=-1, keepdims=True)
        return (x - m) / jnp.sqrt(v + 1e-5) * g + b

    def conv(x, ksz, pad, w, b):
        xp = jnp.pad(x, ((0, 0), (pad, pad), (0, 0)))
        cols = jnp.concatenate([xp[:, j:j + S, :] for j in range(ksz)], axis=-1)
        return cols @ w + b

    res = ln(data, p['ln1_g'], p['ln1_b'])
    key_local = jnp.concatenate(
        [conv(res, 3, 1, p['conv3_w'], p['conv3_b']),
         conv(res, 5, 2, p['conv5_w'], p['conv5_b'])], axis=-1)
    kl = key_local @ p['wkl_w'] + p['wkl_b']
    q = res @ p['wq_w'] + p['wq_b']
    kg = res @ p['wkg_w'] + p['wkg_b']
    v = res @ p['wv_w'] + p['wv_b']

    def heads(t):
        return t.reshape(B, S, H, dk).transpose(0, 2, 1, 3)

    qh, klh, kgh, vh = map(heads, (q, kl, kg, v))

    def attend(kh):
        s = jnp.einsum('bhqd,bhkd->bhqk', qh, kh) / math.sqrt(dk)
        return jnp.einsum('bhqk,bhkd->bhqd', jax.nn.softmax(s, axis=-1), vh)

    x = attend(klh) + attend(kgh)
    x = x.transpose(0, 2, 1, 3).reshape(B, S, D)
    out = data + (x @ p['wo_w'] + p['wo_b'])
    res2 = ln(out, p['ln2_g'], p['ln2_b'])
    h = res2 @ p['ff1_w'] + p['ff1_b']
    return out + (h @ p['ff2_w'] + p['ff2_b'])


# ----------------------------------- main -----------------------------------

if __name__ == "__main__":
    B, S, D, H, FC_RATIO = 2, 8, 32, 4, 2
    key = jax.random.PRNGKey(0)
    kp, kx = jax.random.split(key)
    params = init_params(kp, D, FC_RATIO)
    fused = fuse_params(params, D)
    data = jax.random.normal(kx, (B, S, D), jnp.float32)

    fwd = jax.jit(partial(transformer_encoder, num_heads=H))
    out = fwd(fused, data)
    jax.block_until_ready(out)

    ref = reference_forward(params, data, H)
    assert out.shape == (B, S, D) and out.dtype == jnp.float32
    assert bool(jnp.all(jnp.isfinite(out)))
    max_err = float(jnp.max(jnp.abs(out - ref)))
    assert bool(jnp.allclose(out, ref, rtol=5e-2, atol=5e-2)), max_err
    print("KERNEL_OK")
</pallas_src>

<mosaic_0001>
module attributes {stable_mosaic.version = 11 : i64} {
  func.func @_encoder_kernel(%arg0: i32, %arg1: memref<1x8x32xf32, #tpu.memory_space<vmem>>, %arg2: memref<1x32xf32, #tpu.memory_space<vmem>>, %arg3: memref<1x32xf32, #tpu.memory_space<vmem>>, %arg4: memref<1x32xf32, #tpu.memory_space<vmem>>, %arg5: memref<1x32xf32, #tpu.memory_space<vmem>>, %arg6: memref<96x32xbf16, #tpu.memory_space<vmem>>, %arg7: memref<160x32xbf16, #tpu.memory_space<vmem>>, %arg8: memref<1x32xf32, #tpu.memory_space<vmem>>, %arg9: memref<32x96xbf16, #tpu.memory_space<vmem>>, %arg10: memref<1x96xf32, #tpu.memory_space<vmem>>, %arg11: memref<32x32xbf16, #tpu.memory_space<vmem>>, %arg12: memref<1x32xf32, #tpu.memory_space<vmem>>, %arg13: memref<32x64xbf16, #tpu.memory_space<vmem>>, %arg14: memref<1x64xf32, #tpu.memory_space<vmem>>, %arg15: memref<64x32xbf16, #tpu.memory_space<vmem>>, %arg16: memref<1x32xf32, #tpu.memory_space<vmem>>, %arg17: memref<1x8x32xf32, #tpu.memory_space<vmem>>, %arg18: memref<24x32xf32, #tpu.memory_space<vmem>>) attributes {dimension_semantics = [#tpu.dimension_semantics<parallel>], iteration_bounds = array<i64: 2>, scalar_prefetch = 0 : i64, scratch_operands = 1 : i64, tpu.core_type = #tpu.core_type<tc>, window_params = [{transform_indices = @transform_0, window_bounds = array<i64: 1, 8, 32>}, {pipeline_mode = #tpu.pipeline_mode<synchronous>, transform_indices = @transform_1, window_bounds = array<i64: 1, 32>}, {pipeline_mode = #tpu.pipeline_mode<synchronous>, transform_indices = @transform_2, window_bounds = array<i64: 1, 32>}, {pipeline_mode = #tpu.pipeline_mode<synchronous>, transform_indices = @transform_3, window_bounds = array<i64: 1, 32>}, {pipeline_mode = #tpu.pipeline_mode<synchronous>, transform_indices = @transform_4, window_bounds = array<i64: 1, 32>}, {pipeline_mode = #tpu.pipeline_mode<synchronous>, transform_indices = @transform_5, window_bounds = array<i64: 96, 32>}, {pipeline_mode = #tpu.pipeline_mode<synchronous>, transform_indices = @transform_6, window_bounds = array<i64: 160, 32>}, {pipeline_mode = #tpu.pipeline_mode<synchronous>, transform_indices = @transform_7, window_bounds = array<i64: 1, 32>}, {pipeline_mode = #tpu.pipeline_mode<synchronous>, transform_indices = @transform_8, window_bounds = array<i64: 32, 96>}, {pipeline_mode = #tpu.pipeline_mode<synchronous>, transform_indices = @transform_9, window_bounds = array<i64: 1, 96>}, {pipeline_mode = #tpu.pipeline_mode<synchronous>, transform_indices = @transform_10, window_bounds = array<i64: 32, 32>}, {pipeline_mode = #tpu.pipeline_mode<synchronous>, transform_indices = @transform_11, window_bounds = array<i64: 1, 32>}, {pipeline_mode = #tpu.pipeline_mode<synchronous>, transform_indices = @transform_12, window_bounds = array<i64: 32, 64>}, {pipeline_mode = #tpu.pipeline_mode<synchronous>, transform_indices = @transform_13, window_bounds = array<i64: 1, 64>}, {pipeline_mode = #tpu.pipeline_mode<synchronous>, transform_indices = @transform_14, window_bounds = array<i64: 64, 32>}, {pipeline_mode = #tpu.pipeline_mode<synchronous>, transform_indices = @transform_15, window_bounds = array<i64: 1, 32>}, {transform_indices = @transform_16, window_bounds = array<i64: 1, 8, 32>}]} {
    %c0 = arith.constant 0 : index
    %c0_0 = arith.constant 0 : index
    %c0_1 = arith.constant 0 : index
    %0 = vector.load %arg1[%c0, %c0_0, %c0_1] : memref<1x8x32xf32, #tpu.memory_space<vmem>>, vector<1x8x32xf32>
    %1 = vector.shape_cast %0 : vector<1x8x32xf32> to vector<8x32xf32>
    %cst = arith.constant dense<0.000000e+00> : vector<8xf32>
    %2 = vector.multi_reduction <add>, %1, %cst [1] : vector<8x32xf32> to vector<8xf32>
    %3 = vector.shape_cast %2 : vector<8xf32> to vector<8x1xf32>
    %cst_2 = arith.constant 3.200000e+01 : f32
    %4 = vector.broadcast %cst_2 : f32 to vector<8x1xf32>
    %5 = arith.divf %3, %4 : vector<8x1xf32>
    %6 = vector.broadcast %5 : vector<8x1xf32> to vector<8x32xf32>
    %7 = arith.subf %1, %6 : vector<8x32xf32>
    %8 = arith.mulf %7, %7 : vector<8x32xf32>
    %cst_3 = arith.constant dense<0.000000e+00> : vector<8xf32>
    %9 = vector.multi_reduction <add>, %8, %cst_3 [1] : vector<8x32xf32> to vector<8xf32>
    %10 = vector.shape_cast %9 : vector<8xf32> to vector<8x1xf32>
    %cst_4 = arith.constant 3.200000e+01 : f32
    %11 = vector.broadcast %cst_4 : f32 to vector<8x1xf32>
    %12 = arith.divf %10, %11 : vector<8x1xf32>
    %13 = vector.broadcast %5 : vector<8x1xf32> to vector<8x32xf32>
    %14 = arith.subf %1, %13 : vector<8x32xf32>
    %cst_5 = arith.constant 9.99999974E-6 : f32
    %15 = vector.broadcast %cst_5 : f32 to vector<8x1xf32>
    %16 = arith.addf %12, %15 : vector<8x1xf32>
    %17 = math.rsqrt %16 : vector<8x1xf32>
    %18 = vector.broadcast %17 : vector<8x1xf32> to vector<8x32xf32>
    %19 = arith.mulf %14, %18 : vector<8x32xf32>
    %c0_6 = arith.constant 0 : index
    %c0_7 = arith.constant 0 : index
    %20 = vector.load %arg2[%c0_6, %c0_7] : memref<1x32xf32, #tpu.memory_space<vmem>>, vector<1x32xf32>
    %21 = vector.broadcast %20 : vector<1x32xf32> to vector<8x32xf32>
    %22 = arith.mulf %19, %21 : vector<8x32xf32>
    %c0_8 = arith.constant 0 : index
    %c0_9 = arith.constant 0 : index
    %23 = vector.load %arg3[%c0_8, %c0_9] : memref<1x32xf32, #tpu.memory_space<vmem>>, vector<1x32xf32>
    %24 = vector.broadcast %23 : vector<1x32xf32> to vector<8x32xf32>
    %25 = arith.addf %22, %24 : vector<8x32xf32>
    %cst_10 = arith.constant 0.000000e+00 : f32
    %26 = vector.broadcast %cst_10 : f32 to vector<24x32xf32>
    %c0_11 = arith.constant 0 : index
    %c0_12 = arith.constant 0 : index
    %27 = vector.load %arg18[%c0_11, %c0_12] : memref<24x32xf32, #tpu.memory_space<vmem>>, vector<24x32xf32>
    tpu.vector_store %arg18[%c0_11, %c0_12], %26 {strides = array<i32>} : memref<24x32xf32, #tpu.memory_space<vmem>>, vector<24x32xf32>,
    %c8 = arith.constant 8 : index
    %c0_13 = arith.constant 0 : index
    %28 = vector.load %arg18[%c8, %c0_13] : memref<24x32xf32, #tpu.memory_space<vmem>>, vector<8x32xf32>
    tpu.vector_store %arg18[%c8, %c0_13], %25 {strides = array<i32>} : memref<24x32xf32, #tpu.memory_space<vmem>>, vector<8x32xf32>,
    %cst_14 = arith.constant 0.000000e+00 : f32
    %29 = vector.broadcast %cst_14 : f32 to vector<8x32xf32>
    %c7 = arith.constant 7 : index
    %c0_15 = arith.constant 0 : index
    %30 = vector.load %arg18[%c7, %c0_15] : memref<24x32xf32, #tpu.memory_space<vmem>>, vector<8x32xf32>
    %c0_16 = arith.constant 0 : index
    %c0_17 = arith.constant 0 : index
    %31 = vector.load %arg6[%c0_16, %c0_17] : memref<96x32xbf16, #tpu.memory_space<vmem>>, vector<32x32xbf16>
    %32 = arith.truncf %30 : vector<8x32xf32> to vector<8x32xbf16>
    %cst_18 = arith.constant dense<0.000000e+00> : vector<8x32xf32>
    %33 = tpu.matmul %32, %31, %cst_18 {dimension_numbers = #tpu.dot_dimension_numbers<[1], [0], [0], [1], [0, 0, 1, 1], [], []>} : vector<8x32xbf16>, vector<32x32xbf16>, vector<8x32xf32> -> vector<8x32xf32>
    %34 = arith.addf %29, %33 : vector<8x32xf32>
    %c8_19 = arith.constant 8 : index
    %c0_20 = arith.constant 0 : index
    %35 = vector.load %arg18[%c8_19, %c0_20] : memref<24x32xf32, #tpu.memory_space<vmem>>, vector<8x32xf32>
    %c32 = arith.constant 32 : index
    %c0_21 = arith.constant 0 : index
    %36 = vector.load %arg6[%c32, %c0_21] : memref<96x32xbf16, #tpu.memory_space<vmem>>, vector<32x32xbf16>
    %37 = arith.truncf %35 : vector<8x32xf32> to vector<8x32xbf16>
    %cst_22 = arith.constant dense<0.000000e+00> : vector<8x32xf32>
    %38 = tpu.matmul %37, %36, %cst_22 {dimension_numbers = #tpu.dot_dimension_numbers<[1], [0], [0], [1], [0, 0, 1, 1], [], []>} : vector<8x32xbf16>, vector<32x32xbf16>, vector<8x32xf32> -> vector<8x32xf32>
    %39 = arith.addf %34, %38 : vector<8x32xf32>
    %c9 = arith.constant 9 : index
    %c0_23 = arith.constant 0 : index
    %40 = vector.load %arg18[%c9, %c0_23] : memref<24x32xf32, #tpu.memory_space<vmem>>, vector<8x32xf32>
    %c64 = arith.constant 64 : index
    %c0_24 = arith.constant 0 : index
    %41 = vector.load %arg6[%c64, %c0_24] : memref<96x32xbf16, #tpu.memory_space<vmem>>, vector<32x32xbf16>
    %42 = arith.truncf %40 : vector<8x32xf32> to vector<8x32xbf16>
    %cst_25 = arith.constant dense<0.000000e+00> : vector<8x32xf32>
    %43 = tpu.matmul %42, %41, %cst_25 {dimension_numbers = #tpu.dot_dimension_numbers<[1], [0], [0], [1], [0, 0, 1, 1], [], []>} : vector<8x32xbf16>, vector<32x32xbf16>, vector<8x32xf32> -> vector<8x32xf32>
    %44 = arith.addf %39, %43 : vector<8x32xf32>
    %cst_26 = arith.constant 0.000000e+00 : f32
    %45 = vector.broadcast %cst_26 : f32 to vector<8x32xf32>
    %c6 = arith.constant 6 : index
    %c0_27 = arith.constant 0 : index
    %46 = vector.load %arg18[%c6, %c0_27] : memref<24x32xf32, #tpu.memory_space<vmem>>, vector<8x32xf32>
    %c0_28 = arith.constant 0 : index
    %c0_29 = arith.constant 0 : index
    %47 = vector.load %arg7[%c0_28, %c0_29] : memref<160x32xbf16, #tpu.memory_space<vmem>>, vector<32x32xbf16>
    %48 = arith.truncf %46 : vector<8x32xf32> to vector<8x32xbf16>
    %cst_30 = arith.constant dense<0.000000e+00> : vector<8x32xf32>
    %49 = tpu.matmul %48, %47, %cst_30 {dimension_numbers = #tpu.dot_dimension_numbers<[1], [0], [0], [1], [0, 0, 1, 1], [], []>} : vector<8x32xbf16>, vector<32x32xbf16>, vector<8x32xf32> -> vector<8x32xf32>
    %50 = arith.addf %45, %49 : vector<8x32xf32>
    %c7_31 = arith.constant 7 : index
    %c0_32 = arith.constant 0 : index
    %51 = vector.load %arg18[%c7_31, %c0_32] : memref<24x32xf32, #tpu.memory_space<vmem>>, vector<8x32xf32>
    %c32_33 = arith.constant 32 : index
    %c0_34 = arith.constant 0 : index
    %52 = vector.load %arg7[%c32_33, %c0_34] : memref<160x32xbf16, #tpu.memory_space<vmem>>, vector<32x32xbf16>
    %53 = arith.truncf %51 : vector<8x32xf32> to vector<8x32xbf16>
    %cst_35 = arith.constant dense<0.000000e+00> : vector<8x32xf32>
    %54 = tpu.matmul %53, %52, %cst_35 {dimension_numbers = #tpu.dot_dimension_numbers<[1], [0], [0], [1], [0, 0, 1, 1], [], []>} : vector<8x32xbf16>, vector<32x32xbf16>, vector<8x32xf32> -> vector<8x32xf32>
    %55 = arith.addf %50, %54 : vector<8x32xf32>
    %c8_36 = arith.constant 8 : index
    %c0_37 = arith.constant 0 : index
    %56 = vector.load %arg18[%c8_36, %c0_37] : memref<24x32xf32, #tpu.memory_space<vmem>>, vector<8x32xf32>
    %c64_38 = arith.constant 64 : index
    %c0_39 = arith.constant 0 : index
    %57 = vector.load %arg7[%c64_38, %c0_39] : memref<160x32xbf16, #tpu.memory_space<vmem>>, vector<32x32xbf16>
    %58 = arith.truncf %56 : vector<8x32xf32> to vector<8x32xbf16>
    %cst_40 = arith.constant dense<0.000000e+00> : vector<8x32xf32>
    %59 = tpu.matmul %58, %57, %cst_40 {dimension_numbers = #tpu.dot_dimension_numbers<[1], [0], [0], [1], [0, 0, 1, 1], [], []>} : vector<8x32xbf16>, vector<32x32xbf16>, vector<8x32xf32> -> vector<8x32xf32>
    %60 = arith.addf %55, %59 : vector<8x32xf32>
    %c9_41 = arith.constant 9 : index
    %c0_42 = arith.constant 0 : index
    %61 = vector.load %arg18[%c9_41, %c0_42] : memref<24x32xf32, #tpu.memory_space<vmem>>, vector<8x32xf32>
    %c96 = arith.constant 96 : index
    %c0_43 = arith.constant 0 : index
    %62 = vector.load %arg7[%c96, %c0_43] : memref<160x32xbf16, #tpu.memory_space<vmem>>, vector<32x32xbf16>
    %63 = arith.truncf %61 : vector<8x32xf32> to vector<8x32xbf16>
    %cst_44 = arith.constant dense<0.000000e+00> : vector<8x32xf32>
    %64 = tpu.matmul %63, %62, %cst_44 {dimension_numbers = #tpu.dot_dimension_numbers<[1], [0], [0], [1], [0, 0, 1, 1], [], []>} : vector<8x32xbf16>, vector<32x32xbf16>, vector<8x32xf32> -> vector<8x32xf32>
    %65 = arith.addf %60, %64 : vector<8x32xf32>
    %c10 = arith.constant 10 : index
    %c0_45 = arith.constant 0 : index
    %66 = vector.load %arg18[%c10, %c0_45] : memref<24x32xf32, #tpu.memory_space<vmem>>, vector<8x32xf32>
    %c128 = arith.constant 128 : index
    %c0_46 = arith.constant 0 : index
    %67 = vector.load %arg7[%c128, %c0_46] : memref<160x32xbf16, #tpu.memory_space<vmem>>, vector<32x32xbf16>
    %68 = arith.truncf %66 : vector<8x32xf32> to vector<8x32xbf16>
    %cst_47 = arith.constant dense<0.000000e+00> : vector<8x32xf32>
    %69 = tpu.matmul %68, %67, %cst_47 {dimension_numbers = #tpu.dot_dimension_numbers<[1], [0], [0], [1], [0, 0, 1, 1], [], []>} : vector<8x32xbf16>, vector<32x32xbf16>, vector<8x32xf32> -> vector<8x32xf32>
    %70 = arith.addf %65, %69 : vector<8x32xf32>
    %71 = arith.addf %44, %70 : vector<8x32xf32>
    %c0_48 = arith.constant 0 : index
    %c0_49 = arith.constant 0 : index
    %72 = vector.load %arg8[%c0_48, %c0_49] : memref<1x32xf32, #tpu.memory_space<vmem>>, vector<1x32xf32>
    %73 = vector.broadcast %72 : vector<1x32xf32> to vector<8x32xf32>
    %74 = arith.addf %71, %73 : vector<8x32xf32>
    %c0_50 = arith.constant 0 : index
    %c0_51 = arith.constant 0 : index
    %75 = vector.load %arg9[%c0_50, %c0_51] : memref<32x96xbf16, #tpu.memory_space<vmem>>, vector<32x96xbf16>
    %76 = arith.truncf %25 : vector<8x32xf32> to vector<8x32xbf16>
    %cst_52 = arith.constant dense<0.000000e+00> : vector<8x96xf32>
    %77 = tpu.matmul %76, %75, %cst_52 {dimension_numbers = #tpu.dot_dimension_numbers<[1], [0], [0], [1], [0, 0, 1, 1], [], []>} : vector<8x32xbf16>, vector<32x96xbf16>, vector<8x96xf32> -> vector<8x96xf32>
    %c0_53 = arith.constant 0 : index
    %c0_54 = arith.constant 0 : index
    %78 = vector.load %arg10[%c0_53, %c0_54] : memref<1x96xf32, #tpu.memory_space<vmem>>, vector<1x96xf32>
    %79 = vector.broadcast %78 : vector<1x96xf32> to vector<8x96xf32>
    %80 = arith.addf %77, %79 : vector<8x96xf32>
    %81 = arith.truncf %80 : vector<8x96xf32> to vector<8x96xbf16>
    %82 = arith.truncf %74 : vector<8x32xf32> to vector<8x32xbf16>
    %cst_55 = arith.constant 0.000000e+00 : f32
    %83 = vector.broadcast %cst_55 : f32 to vector<8x32xf32>
    %84 = vector.extract_strided_slice %81 {offsets = [0, 0], sizes = [8, 8], strides = [1, 1]} : vector<8x96xbf16> to vector<8x8xbf16>
    %85 = vector.extract_strided_slice %81 {offsets = [0, 32], sizes = [8, 8], strides = [1, 1]} : vector<8x96xbf16> to vector<8x8xbf16>
    %86 = vector.extract_strided_slice %81 {offsets = [0, 64], sizes = [8, 8], strides = [1, 1]} : vector<8x96xbf16> to vector<8x8xbf16>
    %87 = vector.extract_strided_slice %82 {offsets = [0, 0], sizes = [8, 8], strides = [1, 1]} : vector<8x32xbf16> to vector<8x8xbf16>
    %cst_56 = arith.constant dense<0.000000e+00> : vector<8x8xf32>
    %88 = tpu.matmul %84, %87, %cst_56 {dimension_numbers = #tpu.dot_dimension_numbers<[1], [1], [0], [0], [0, 0, 1, 0], [], []>} : vector<8x8xbf16>, vector<8x8xbf16>, vector<8x8xf32> -> vector<8x8xf32>
    %cst_57 = arith.constant 0.353553385 : f32
    %89 = vector.broadcast %cst_57 : f32 to vector<8x8xf32>
    %90 = arith.mulf %88, %89 : vector<8x8xf32>
    %cst_58 = arith.constant dense<0xFF800000> : vector<8xf32>
    %91 = vector.multi_reduction <maximumf>, %90, %cst_58 [1] : vector<8x8xf32> to vector<8xf32>
    %92 = vector.shape_cast %91 : vector<8xf32> to vector<8x1xf32>
    %93 = vector.broadcast %92 : vector<8x1xf32> to vector<8x8xf32>
    %94 = arith.subf %90, %93 : vector<8x8xf32>
    %95 = math.exp %94 : vector<8x8xf32>
    %cst_59 = arith.constant dense<0.000000e+00> : vector<8xf32>
    %96 = vector.multi_reduction <add>, %95, %cst_59 [1] : vector<8x8xf32> to vector<8xf32>
    %97 = vector.shape_cast %96 : vector<8xf32> to vector<8x1xf32>
    %98 = tpu.reciprocal %97 {approx = true} : vector<8x1xf32> -> vector<8x1xf32>
    %99 = vector.broadcast %98 : vector<8x1xf32> to vector<8x8xf32>
    %100 = arith.mulf %95, %99 : vector<8x8xf32>
    %101 = arith.truncf %100 : vector<8x8xf32> to vector<8x8xbf16>
    %cst_60 = arith.constant dense<0.000000e+00> : vector<8x8xf32>
    %102 = tpu.matmul %101, %86, %cst_60 {dimension_numbers = #tpu.dot_dimension_numbers<[1], [0], [0], [1], [0, 0, 1, 1], [], []>} : vector<8x8xbf16>, vector<8x8xbf16>, vector<8x8xf32> -> vector<8x8xf32>
    %cst_61 = arith.constant dense<0.000000e+00> : vector<8x8xf32>
    %103 = tpu.matmul %84, %85, %cst_61 {dimension_numbers = #tpu.dot_dimension_numbers<[1], [1], [0], [0], [0, 0, 1, 0], [], []>} : vector<8x8xbf16>, vector<8x8xbf16>, vector<8x8xf32> -> vector<8x8xf32>
    %cst_62 = arith.constant 0.353553385 : f32
    %104 = vector.broadcast %cst_62 : f32 to vector<8x8xf32>
    %105 = arith.mulf %103, %104 : vector<8x8xf32>
    %cst_63 = arith.constant dense<0xFF800000> : vector<8xf32>
    %106 = vector.multi_reduction <maximumf>, %105, %cst_63 [1] : vector<8x8xf32> to vector<8xf32>
    %107 = vector.shape_cast %106 : vector<8xf32> to vector<8x1xf32>
    %108 = vector.broadcast %107 : vector<8x1xf32> to vector<8x8xf32>
    %109 = arith.subf %105, %108 : vector<8x8xf32>
    %110 = math.exp %109 : vector<8x8xf32>
    %cst_64 = arith.constant dense<0.000000e+00> : vector<8xf32>
    %111 = vector.multi_reduction <add>, %110, %cst_64 [1] : vector<8x8xf32> to vector<8xf32>
    %112 = vector.shape_cast %111 : vector<8xf32> to vector<8x1xf32>
    %113 = tpu.reciprocal %112 {approx = true} : vector<8x1xf32> -> vector<8x1xf32>
    %114 = vector.broadcast %113 : vector<8x1xf32> to vector<8x8xf32>
    %115 = arith.mulf %110, %114 : vector<8x8xf32>
    %116 = arith.truncf %115 : vector<8x8xf32> to vector<8x8xbf16>
    %cst_65 = arith.constant dense<0.000000e+00> : vector<8x8xf32>
    %117 = tpu.matmul %116, %86, %cst_65 {dimension_numbers = #tpu.dot_dimension_numbers<[1], [0], [0], [1], [0, 0, 1, 1], [], []>} : vector<8x8xbf16>, vector<8x8xbf16>, vector<8x8xf32> -> vector<8x8xf32>
    %118 = arith.addf %102, %117 : vector<8x8xf32>
    %c0_66 = arith.constant 0 : index
    %c0_67 = arith.constant 0 : index
    %119 = vector.load %arg11[%c0_66, %c0_67] : memref<32x32xbf16, #tpu.memory_space<vmem>>, vector<8x32xbf16>
    %120 = arith.truncf %118 : vector<8x8xf32> to vector<8x8xbf16>
    %cst_68 = arith.constant dense<0.000000e+00> : vector<8x32xf32>
    %121 = tpu.matmul %120, %119, %cst_68 {dimension_numbers = #tpu.dot_dimension_numbers<[1], [0], [0], [1], [0, 0, 1, 1], [], []>} : vector<8x8xbf16>, vector<8x32xbf16>, vector<8x32xf32> -> vector<8x32xf32>
    %122 = arith.addf %83, %121 : vector<8x32xf32>
    %123 = vector.extract_strided_slice %81 {offsets = [0, 8], sizes = [8, 8], strides = [1, 1]} : vector<8x96xbf16> to vector<8x8xbf16>
    %124 = vector.extract_strided_slice %81 {offsets = [0, 40], sizes = [8, 8], strides = [1, 1]} : vector<8x96xbf16> to vector<8x8xbf16>
    %125 = vector.extract_strided_slice %81 {offsets = [0, 72], sizes = [8, 8], strides = [1, 1]} : vector<8x96xbf16> to vector<8x8xbf16>
    %126 = vector.extract_strided_slice %82 {offsets = [0, 8], sizes = [8, 8], strides = [1, 1]} : vector<8x32xbf16> to vector<8x8xbf16>
    %cst_69 = arith.constant dense<0.000000e+00> : vector<8x8xf32>
    %127 = tpu.matmul %123, %126, %cst_69 {dimension_numbers = #tpu.dot_dimension_numbers<[1], [1], [0], [0], [0, 0, 1, 0], [], []>} : vector<8x8xbf16>, vector<8x8xbf16>, vector<8x8xf32> -> vector<8x8xf32>
    %cst_70 = arith.constant 0.353553385 : f32
    %128 = vector.broadcast %cst_70 : f32 to vector<8x8xf32>
    %129 = arith.mulf %127, %128 : vector<8x8xf32>
    %cst_71 = arith.constant dense<0xFF800000> : vector<8xf32>
    %130 = vector.multi_reduction <maximumf>, %129, %cst_71 [1] : vector<8x8xf32> to vector<8xf32>
    %131 = vector.shape_cast %130 : vector<8xf32> to vector<8x1xf32>
    %132 = vector.broadcast %131 : vector<8x1xf32> to vector<8x8xf32>
    %133 = arith.subf %129, %132 : vector<8x8xf32>
    %134 = math.exp %133 : vector<8x8xf32>
    %cst_72 = arith.constant dense<0.000000e+00> : vector<8xf32>
    %135 = vector.multi_reduction <add>, %134, %cst_72 [1] : vector<8x8xf32> to vector<8xf32>
    %136 = vector.shape_cast %135 : vector<8xf32> to vector<8x1xf32>
    %137 = tpu.reciprocal %136 {approx = true} : vector<8x1xf32> -> vector<8x1xf32>
    %138 = vector.broadcast %137 : vector<8x1xf32> to vector<8x8xf32>
    %139 = arith.mulf %134, %138 : vector<8x8xf32>
    %140 = arith.truncf %139 : vector<8x8xf32> to vector<8x8xbf16>
    %cst_73 = arith.constant dense<0.000000e+00> : vector<8x8xf32>
    %141 = tpu.matmul %140, %125, %cst_73 {dimension_numbers = #tpu.dot_dimension_numbers<[1], [0], [0], [1], [0, 0, 1, 1], [], []>} : vector<8x8xbf16>, vector<8x8xbf16>, vector<8x8xf32> -> vector<8x8xf32>
    %cst_74 = arith.constant dense<0.000000e+00> : vector<8x8xf32>
    %142 = tpu.matmul %123, %124, %cst_74 {dimension_numbers = #tpu.dot_dimension_numbers<[1], [1], [0], [0], [0, 0, 1, 0], [], []>} : vector<8x8xbf16>, vector<8x8xbf16>, vector<8x8xf32> -> vector<8x8xf32>
    %cst_75 = arith.constant 0.353553385 : f32
    %143 = vector.broadcast %cst_75 : f32 to vector<8x8xf32>
    %144 = arith.mulf %142, %143 : vector<8x8xf32>
    %cst_76 = arith.constant dense<0xFF800000> : vector<8xf32>
    %145 = vector.multi_reduction <maximumf>, %144, %cst_76 [1] : vector<8x8xf32> to vector<8xf32>
    %146 = vector.shape_cast %145 : vector<8xf32> to vector<8x1xf32>
    %147 = vector.broadcast %146 : vector<8x1xf32> to vector<8x8xf32>
    %148 = arith.subf %144, %147 : vector<8x8xf32>
    %149 = math.exp %148 : vector<8x8xf32>
    %cst_77 = arith.constant dense<0.000000e+00> : vector<8xf32>
    %150 = vector.multi_reduction <add>, %149, %cst_77 [1] : vector<8x8xf32> to vector<8xf32>
    %151 = vector.shape_cast %150 : vector<8xf32> to vector<8x1xf32>
    %152 = tpu.reciprocal %151 {approx = true} : vector<8x1xf32> -> vector<8x1xf32>
    %153 = vector.broadcast %152 : vector<8x1xf32> to vector<8x8xf32>
    %154 = arith.mulf %149, %153 : vector<8x8xf32>
    %155 = arith.truncf %154 : vector<8x8xf32> to vector<8x8xbf16>
    %cst_78 = arith.constant dense<0.000000e+00> : vector<8x8xf32>
    %156 = tpu.matmul %155, %125, %cst_78 {dimension_numbers = #tpu.dot_dimension_numbers<[1], [0], [0], [1], [0, 0, 1, 1], [], []>} : vector<8x8xbf16>, vector<8x8xbf16>, vector<8x8xf32> -> vector<8x8xf32>
    %157 = arith.addf %141, %156 : vector<8x8xf32>
    %c8_79 = arith.constant 8 : index
    %c0_80 = arith.constant 0 : index
    %158 = vector.load %arg11[%c8_79, %c0_80] : memref<32x32xbf16, #tpu.memory_space<vmem>>, vector<8x32xbf16>
    %159 = arith.truncf %157 : vector<8x8xf32> to vector<8x8xbf16>
    %cst_81 = arith.constant dense<0.000000e+00> : vector<8x32xf32>
    %160 = tpu.matmul %159, %158, %cst_81 {dimension_numbers = #tpu.dot_dimension_numbers<[1], [0], [0], [1], [0, 0, 1, 1], [], []>} : vector<8x8xbf16>, vector<8x32xbf16>, vector<8x32xf32> -> vector<8x32xf32>
    %161 = arith.addf %122, %160 : vector<8x32xf32>
    %162 = vector.extract_strided_slice %81 {offsets = [0, 16], sizes = [8, 8], strides = [1, 1]} : vector<8x96xbf16> to vector<8x8xbf16>
    %163 = vector.extract_strided_slice %81 {offsets = [0, 48], sizes = [8, 8], strides = [1, 1]} : vector<8x96xbf16> to vector<8x8xbf16>
    %164 = vector.extract_strided_slice %81 {offsets = [0, 80], sizes = [8, 8], strides = [1, 1]} : vector<8x96xbf16> to vector<8x8xbf16>
    %165 = vector.extract_strided_slice %82 {offsets = [0, 16], sizes = [8, 8], strides = [1, 1]} : vector<8x32xbf16> to vector<8x8xbf16>
    %cst_82 = arith.constant dense<0.000000e+00> : vector<8x8xf32>
    %166 = tpu.matmul %162, %165, %cst_82 {dimension_numbers = #tpu.dot_dimension_numbers<[1], [1], [0], [0], [0, 0, 1, 0], [], []>} : vector<8x8xbf16>, vector<8x8xbf16>, vector<8x8xf32> -> vector<8x8xf32>
    %cst_83 = arith.constant 0.353553385 : f32
    %167 = vector.broadcast %cst_83 : f32 to vector<8x8xf32>
    %168 = arith.mulf %166, %167 : vector<8x8xf32>
    %cst_84 = arith.constant dense<0xFF800000> : vector<8xf32>
    %169 = vector.multi_reduction <maximumf>, %168, %cst_84 [1] : vector<8x8xf32> to vector<8xf32>
    %170 = vector.shape_cast %169 : vector<8xf32> to vector<8x1xf32>
    %171 = vector.broadcast %170 : vector<8x1xf32> to vector<8x8xf32>
    %172 = arith.subf %168, %171 : vector<8x8xf32>
    %173 = math.exp %172 : vector<8x8xf32>
    %cst_85 = arith.constant dense<0.000000e+00> : vector<8xf32>
    %174 = vector.multi_reduction <add>, %173, %cst_85 [1] : vector<8x8xf32> to vector<8xf32>
    %175 = vector.shape_cast %174 : vector<8xf32> to vector<8x1xf32>
    %176 = tpu.reciprocal %175 {approx = true} : vector<8x1xf32> -> vector<8x1xf32>
    %177 = vector.broadcast %176 : vector<8x1xf32> to vector<8x8xf32>
    %178 = arith.mulf %173, %177 : vector<8x8xf32>
    %179 = arith.truncf %178 : vector<8x8xf32> to vector<8x8xbf16>
    %cst_86 = arith.constant dense<0.000000e+00> : vector<8x8xf32>
    %180 = tpu.matmul %179, %164, %cst_86 {dimension_numbers = #tpu.dot_dimension_numbers<[1], [0], [0], [1], [0, 0, 1, 1], [], []>} : vector<8x8xbf16>, vector<8x8xbf16>, vector<8x8xf32> -> vector<8x8xf32>
    %cst_87 = arith.constant dense<0.000000e+00> : vector<8x8xf32>
    %181 = tpu.matmul %162, %163, %cst_87 {dimension_numbers = #tpu.dot_dimension_numbers<[1], [1], [0], [0], [0, 0, 1, 0], [], []>} : vector<8x8xbf16>, vector<8x8xbf16>, vector<8x8xf32> -> vector<8x8xf32>
    %cst_88 = arith.constant 0.353553385 : f32
    %182 = vector.broadcast %cst_88 : f32 to vector<8x8xf32>
    %183 = arith.mulf %181, %182 : vector<8x8xf32>
    %cst_89 = arith.constant dense<0xFF800000> : vector<8xf32>
    %184 = vector.multi_reduction <maximumf>, %183, %cst_89 [1] : vector<8x8xf32> to vector<8xf32>
    %185 = vector.shape_cast %184 : vector<8xf32> to vector<8x1xf32>
    %186 = vector.broadcast %185 : vector<8x1xf32> to vector<8x8xf32>
    %187 = arith.subf %183, %186 : vector<8x8xf32>
    %188 = math.exp %187 : vector<8x8xf32>
    %cst_90 = arith.constant dense<0.000000e+00> : vector<8xf32>
    %189 = vector.multi_reduction <add>, %188, %cst_90 [1] : vector<8x8xf32> to vector<8xf32>
    %190 = vector.shape_cast %189 : vector<8xf32> to vector<8x1xf32>
    %191 = tpu.reciprocal %190 {approx = true} : vector<8x1xf32> -> vector<8x1xf32>
    %192 = vector.broadcast %191 : vector<8x1xf32> to vector<8x8xf32>
    %193 = arith.mulf %188, %192 : vector<8x8xf32>
    %194 = arith.truncf %193 : vector<8x8xf32> to vector<8x8xbf16>
    %cst_91 = arith.constant dense<0.000000e+00> : vector<8x8xf32>
    %195 = tpu.matmul %194, %164, %cst_91 {dimension_numbers = #tpu.dot_dimension_numbers<[1], [0], [0], [1], [0, 0, 1, 1], [], []>} : vector<8x8xbf16>, vector<8x8xbf16>, vector<8x8xf32> -> vector<8x8xf32>
    %196 = arith.addf %180, %195 : vector<8x8xf32>
    %c16 = arith.constant 16 : index
    %c0_92 = arith.constant 0 : index
    %197 = vector.load %arg11[%c16, %c0_92] : memref<32x32xbf16, #tpu.memory_space<vmem>>, vector<8x32xbf16>
    %198 = arith.truncf %196 : vector<8x8xf32> to vector<8x8xbf16>
    %cst_93 = arith.constant dense<0.000000e+00> : vector<8x32xf32>
    %199 = tpu.matmul %198, %197, %cst_93 {dimension_numbers = #tpu.dot_dimension_numbers<[1], [0], [0], [1], [0, 0, 1, 1], [], []>} : vector<8x8xbf16>, vector<8x32xbf16>, vector<8x32xf32> -> vector<8x32xf32>
    %200 = arith.addf %161, %199 : vector<8x32xf32>
    %201 = vector.extract_strided_slice %81 {offsets = [0, 24], sizes = [8, 8], strides = [1, 1]} : vector<8x96xbf16> to vector<8x8xbf16>
    %202 = vector.extract_strided_slice %81 {offsets = [0, 56], sizes = [8, 8], strides = [1, 1]} : vector<8x96xbf16> to vector<8x8xbf16>
    %203 = vector.extract_strided_slice %81 {offsets = [0, 88], sizes = [8, 8], strides = [1, 1]} : vector<8x96xbf16> to vector<8x8xbf16>
    %204 = vector.extract_strided_slice %82 {offsets = [0, 24], sizes = [8, 8], strides = [1, 1]} : vector<8x32xbf16> to vector<8x8xbf16>
    %cst_94 = arith.constant dense<0.000000e+00> : vector<8x8xf32>
    %205 = tpu.matmul %201, %204, %cst_94 {dimension_numbers = #tpu.dot_dimension_numbers<[1], [1], [0], [0], [0, 0, 1, 0], [], []>} : vector<8x8xbf16>, vector<8x8xbf16>, vector<8x8xf32> -> vector<8x8xf32>
    %cst_95 = arith.constant 0.353553385 : f32
    %206 = vector.broadcast %cst_95 : f32 to vector<8x8xf32>
    %207 = arith.mulf %205, %206 : vector<8x8xf32>
    %cst_96 = arith.constant dense<0xFF800000> : vector<8xf32>
    %208 = vector.multi_reduction <maximumf>, %207, %cst_96 [1] : vector<8x8xf32> to vector<8xf32>
    %209 = vector.shape_cast %208 : vector<8xf32> to vector<8x1xf32>
    %210 = vector.broadcast %209 : vector<8x1xf32> to vector<8x8xf32>
    %211 = arith.subf %207, %210 : vector<8x8xf32>
    %212 = math.exp %211 : vector<8x8xf32>
    %cst_97 = arith.constant dense<0.000000e+00> : vector<8xf32>
    %213 = vector.multi_reduction <add>, %212, %cst_97 [1] : vector<8x8xf32> to vector<8xf32>
    %214 = vector.shape_cast %213 : vector<8xf32> to vector<8x1xf32>
    %215 = tpu.reciprocal %214 {approx = true} : vector<8x1xf32> -> vector<8x1xf32>
    %216 = vector.broadcast %215 : vector<8x1xf32> to vector<8x8xf32>
    %217 = arith.mulf %212, %216 : vector<8x8xf32>
    %218 = arith.truncf %217 : vector<8x8xf32> to vector<8x8xbf16>
    %cst_98 = arith.constant dense<0.000000e+00> : vector<8x8xf32>
    %219 = tpu.matmul %218, %203, %cst_98 {dimension_numbers = #tpu.dot_dimension_numbers<[1], [0], [0], [1], [0, 0, 1, 1], [], []>} : vector<8x8xbf16>, vector<8x8xbf16>, vector<8x8xf32> -> vector<8x8xf32>
    %cst_99 = arith.constant dense<0.000000e+00> : vector<8x8xf32>
    %220 = tpu.matmul %201, %202, %cst_99 {dimension_numbers = #tpu.dot_dimension_numbers<[1], [1], [0], [0], [0, 0, 1, 0], [], []>} : vector<8x8xbf16>, vector<8x8xbf16>, vector<8x8xf32> -> vector<8x8xf32>
    %cst_100 = arith.constant 0.353553385 : f32
    %221 = vector.broadcast %cst_100 : f32 to vector<8x8xf32>
    %222 = arith.mulf %220, %221 : vector<8x8xf32>
    %cst_101 = arith.constant dense<0xFF800000> : vector<8xf32>
    %223 = vector.multi_reduction <maximumf>, %222, %cst_101 [1] : vector<8x8xf32> to vector<8xf32>
    %224 = vector.shape_cast %223 : vector<8xf32> to vector<8x1xf32>
    %225 = vector.broadcast %224 : vector<8x1xf32> to vector<8x8xf32>
    %226 = arith.subf %222, %225 : vector<8x8xf32>
    %227 = math.exp %226 : vector<8x8xf32>
    %cst_102 = arith.constant dense<0.000000e+00> : vector<8xf32>
    %228 = vector.multi_reduction <add>, %227, %cst_102 [1] : vector<8x8xf32> to vector<8xf32>
    %229 = vector.shape_cast %228 : vector<8xf32> to vector<8x1xf32>
    %230 = tpu.reciprocal %229 {approx = true} : vector<8x1xf32> -> vector<8x1xf32>
    %231 = vector.broadcast %230 : vector<8x1xf32> to vector<8x8xf32>
    %232 = arith.mulf %227, %231 : vector<8x8xf32>
    %233 = arith.truncf %232 : vector<8x8xf32> to vector<8x8xbf16>
    %cst_103 = arith.constant dense<0.000000e+00> : vector<8x8xf32>
    %234 = tpu.matmul %233, %203, %cst_103 {dimension_numbers = #tpu.dot_dimension_numbers<[1], [0], [0], [1], [0, 0, 1, 1], [], []>} : vector<8x8xbf16>, vector<8x8xbf16>, vector<8x8xf32> -> vector<8x8xf32>
    %235 = arith.addf %219, %234 : vector<8x8xf32>
    %c24 = arith.constant 24 : index
    %c0_104 = arith.constant 0 : index
    %236 = vector.load %arg11[%c24, %c0_104] : memref<32x32xbf16, #tpu.memory_space<vmem>>, vector<8x32xbf16>
    %237 = arith.truncf %235 : vector<8x8xf32> to vector<8x8xbf16>
    %cst_105 = arith.constant dense<0.000000e+00> : vector<8x32xf32>
    %238 = tpu.matmul %237, %236, %cst_105 {dimension_numbers = #tpu.dot_dimension_numbers<[1], [0], [0], [1], [0, 0, 1, 1], [], []>} : vector<8x8xbf16>, vector<8x32xbf16>, vector<8x32xf32> -> vector<8x32xf32>
    %239 = arith.addf %200, %238 : vector<8x32xf32>
    %240 = arith.addf %1, %239 : vector<8x32xf32>
    %c0_106 = arith.constant 0 : index
    %c0_107 = arith.constant 0 : index
    %241 = vector.load %arg12[%c0_106, %c0_107] : memref<1x32xf32, #tpu.memory_space<vmem>>, vector<1x32xf32>
    %242 = vector.broadcast %241 : vector<1x32xf32> to vector<8x32xf32>
    %243 = arith.addf %240, %242 : vector<8x32xf32>
    %cst_108 = arith.constant dense<0.000000e+00> : vector<8xf32>
    %244 = vector.multi_reduction <add>, %243, %cst_108 [1] : vector<8x32xf32> to vector<8xf32>
    %245 = vector.shape_cast %244 : vector<8xf32> to vector<8x1xf32>
    %cst_109 = arith.constant 3.200000e+01 : f32
    %246 = vector.broadcast %cst_109 : f32 to vector<8x1xf32>
    %247 = arith.divf %245, %246 : vector<8x1xf32>
    %248 = vector.broadcast %247 : vector<8x1xf32> to vector<8x32xf32>
    %249 = arith.subf %243, %248 : vector<8x32xf32>
    %250 = arith.mulf %249, %249 : vector<8x32xf32>
    %cst_110 = arith.constant dense<0.000000e+00> : vector<8xf32>
    %251 = vector.multi_reduction <add>, %250, %cst_110 [1] : vector<8x32xf32> to vector<8xf32>
    %252 = vector.shape_cast %251 : vector<8xf32> to vector<8x1xf32>
    %cst_111 = arith.constant 3.200000e+01 : f32
    %253 = vector.broadcast %cst_111 : f32 to vector<8x1xf32>
    %254 = arith.divf %252, %253 : vector<8x1xf32>
    %255 = vector.broadcast %247 : vector<8x1xf32> to vector<8x32xf32>
    %256 = arith.subf %243, %255 : vector<8x32xf32>
    %cst_112 = arith.constant 9.99999974E-6 : f32
    %257 = vector.broadcast %cst_112 : f32 to vector<8x1xf32>
    %258 = arith.addf %254, %257 : vector<8x1xf32>
    %259 = math.rsqrt %258 : vector<8x1xf32>
    %260 = vector.broadcast %259 : vector<8x1xf32> to vector<8x32xf32>
    %261 = arith.mulf %256, %260 : vector<8x32xf32>
    %c0_113 = arith.constant 0 : index
    %c0_114 = arith.constant 0 : index
    %262 = vector.load %arg4[%c0_113, %c0_114] : memref<1x32xf32, #tpu.memory_space<vmem>>, vector<1x32xf32>
    %263 = vector.broadcast %262 : vector<1x32xf32> to vector<8x32xf32>
    %264 = arith.mulf %261, %263 : vector<8x32xf32>
    %c0_115 = arith.constant 0 : index
    %c0_116 = arith.constant 0 : index
    %265 = vector.load %arg5[%c0_115, %c0_116] : memref<1x32xf32, #tpu.memory_space<vmem>>, vector<1x32xf32>
    %266 = vector.broadcast %265 : vector<1x32xf32> to vector<8x32xf32>
    %267 = arith.addf %264, %266 : vector<8x32xf32>
    %c0_117 = arith.constant 0 : index
    %c0_118 = arith.constant 0 : index
    %268 = vector.load %arg13[%c0_117, %c0_118] : memref<32x64xbf16, #tpu.memory_space<vmem>>, vector<32x64xbf16>
    %269 = arith.truncf %267 : vector<8x32xf32> to vector<8x32xbf16>
    %cst_119 = arith.constant dense<0.000000e+00> : vector<8x64xf32>
    %270 = tpu.matmul %269, %268, %cst_119 {dimension_numbers = #tpu.dot_dimension_numbers<[1], [0], [0], [1], [0, 0, 1, 1], [], []>} : vector<8x32xbf16>, vector<32x64xbf16>, vector<8x64xf32> -> vector<8x64xf32>
    %c0_120 = arith.constant 0 : index
    %c0_121 = arith.constant 0 : index
    %271 = vector.load %arg14[%c0_120, %c0_121] : memref<1x64xf32, #tpu.memory_space<vmem>>, vector<1x64xf32>
    %272 = vector.broadcast %271 : vector<1x64xf32> to vector<8x64xf32>
    %273 = arith.addf %270, %272 : vector<8x64xf32>
    %c0_122 = arith.constant 0 : index
    %c0_123 = arith.constant 0 : index
    %274 = vector.load %arg15[%c0_122, %c0_123] : memref<64x32xbf16, #tpu.memory_space<vmem>>, vector<64x32xbf16>
    %275 = arith.truncf %273 : vector<8x64xf32> to vector<8x64xbf16>
    %cst_124 = arith.constant dense<0.000000e+00> : vector<8x32xf32>
    %276 = tpu.matmul %275, %274, %cst_124 {dimension_numbers = #tpu.dot_dimension_numbers<[1], [0], [0], [1], [0, 0, 1, 1], [], []>} : vector<8x64xbf16>, vector<64x32xbf16>, vector<8x32xf32> -> vector<8x32xf32>
    %c0_125 = arith.constant 0 : index
    %c0_126 = arith.constant 0 : index
    %277 = vector.load %arg16[%c0_125, %c0_126] : memref<1x32xf32, #tpu.memory_space<vmem>>, vector<1x32xf32>
    %278 = vector.broadcast %277 : vector<1x32xf32> to vector<8x32xf32>
    %279 = arith.addf %276, %278 : vector<8x32xf32>
    %280 = arith.addf %243, %279 : vector<8x32xf32>
    %c0_127 = arith.constant 0 : index
    %c0_128 = arith.constant 0 : index
    %c0_129 = arith.constant 0 : index
    %281 = vector.load %arg17[%c0_127, %c0_128, %c0_129] : memref<1x8x32xf32, #tpu.memory_space<vmem>>, vector<1x8x32xf32>
    %282 = vector.shape_cast %281 : vector<1x8x32xf32> to vector<8x32xf32>
    %283 = vector.shape_cast %280 : vector<8x32xf32> to vector<1x8x32xf32>
    tpu.vector_store %arg17[%c0_127, %c0_128, %c0_129], %283 {strides = array<i32>} : memref<1x8x32xf32, #tpu.memory_space<vmem>>, vector<1x8x32xf32>,
    return
  }
  func.func @transform_0(%arg0: i32) -> (i32, i32, i32) {
    %c0_i32 = arith.constant 0 : i32
    %c0_i32_0 = arith.constant 0 : i32
    %c0_i32_1 = arith.constant 0 : i32
    return %arg0, %c0_i32, %c0_i32_0 : i32, i32, i32
  }
  func.func @transform_1(%arg0: i32) -> (i32, i32) {
    %c0_i32 = arith.constant 0 : i32
    %c0_i32_0 = arith.constant 0 : i32
    %c0_i32_1 = arith.constant 0 : i32
    return %c0_i32, %c0_i32_0 : i32, i32
  }
  func.func @transform_2(%arg0: i32) -> (i32, i32) {
    %c0_i32 = arith.constant 0 : i32
    %c0_i32_0 = arith.constant 0 : i32
    %c0_i32_1 = arith.constant 0 : i32
    return %c0_i32, %c0_i32_0 : i32, i32
  }
  func.func @transform_3(%arg0: i32) -> (i32, i32) {
    %c0_i32 = arith.constant 0 : i32
    %c0_i32_0 = arith.constant 0 : i32
    %c0_i32_1 = arith.constant 0 : i32
    return %c0_i32, %c0_i32_0 : i32, i32
  }
  func.func @transform_4(%arg0: i32) -> (i32, i32) {
    %c0_i32 = arith.constant 0 : i32
    %c0_i32_0 = arith.constant 0 : i32
    %c0_i32_1 = arith.constant 0 : i32
    return %c0_i32, %c0_i32_0 : i32, i32
  }
  func.func @transform_5(%arg0: i32) -> (i32, i32) {
    %c0_i32 = arith.constant 0 : i32
    %c0_i32_0 = arith.constant 0 : i32
    %c0_i32_1 = arith.constant 0 : i32
    return %c0_i32, %c0_i32_0 : i32, i32
  }
  func.func @transform_6(%arg0: i32) -> (i32, i32) {
    %c0_i32 = arith.constant 0 : i32
    %c0_i32_0 = arith.constant 0 : i32
    %c0_i32_1 = arith.constant 0 : i32
    return %c0_i32, %c0_i32_0 : i32, i32
  }
  func.func @transform_7(%arg0: i32) -> (i32, i32) {
    %c0_i32 = arith.constant 0 : i32
    %c0_i32_0 = arith.constant 0 : i32
    %c0_i32_1 = arith.constant 0 : i32
    return %c0_i32, %c0_i32_0 : i32, i32
  }
  func.func @transform_8(%arg0: i32) -> (i32, i32) {
    %c0_i32 = arith.constant 0 : i32
    %c0_i32_0 = arith.constant 0 : i32
    %c0_i32_1 = arith.constant 0 : i32
    return %c0_i32, %c0_i32_0 : i32, i32
  }
  func.func @transform_9(%arg0: i32) -> (i32, i32) {
    %c0_i32 = arith.constant 0 : i32
    %c0_i32_0 = arith.constant 0 : i32
    %c0_i32_1 = arith.constant 0 : i32
    return %c0_i32, %c0_i32_0 : i32, i32
  }
  func.func @transform_10(%arg0: i32) -> (i32, i32) {
    %c0_i32 = arith.constant 0 : i32
    %c0_i32_0 = arith.constant 0 : i32
    %c0_i32_1 = arith.constant 0 : i32
    return %c0_i32, %c0_i32_0 : i32, i32
  }
  func.func @transform_11(%arg0: i32) -> (i32, i32) {
    %c0_i32 = arith.constant 0 : i32
    %c0_i32_0 = arith.constant 0 : i32
    %c0_i32_1 = arith.constant 0 : i32
    return %c0_i32, %c0_i32_0 : i32, i32
  }
  func.func @transform_12(%arg0: i32) -> (i32, i32) {
    %c0_i32 = arith.constant 0 : i32
    %c0_i32_0 = arith.constant 0 : i32
    %c0_i32_1 = arith.constant 0 : i32
    return %c0_i32, %c0_i32_0 : i32, i32
  }
  func.func @transform_13(%arg0: i32) -> (i32, i32) {
    %c0_i32 = arith.constant 0 : i32
    %c0_i32_0 = arith.constant 0 : i32
    %c0_i32_1 = arith.constant 0 : i32
    return %c0_i32, %c0_i32_0 : i32, i32
  }
  func.func @transform_14(%arg0: i32) -> (i32, i32) {
    %c0_i32 = arith.constant 0 : i32
    %c0_i32_0 = arith.constant 0 : i32
    %c0_i32_1 = arith.constant 0 : i32
    return %c0_i32, %c0_i32_0 : i32, i32
  }
  func.func @transform_15(%arg0: i32) -> (i32, i32) {
    %c0_i32 = arith.constant 0 : i32
    %c0_i32_0 = arith.constant 0 : i32
    %c0_i32_1 = arith.constant 0 : i32
    return %c0_i32, %c0_i32_0 : i32, i32
  }
  func.func @transform_16(%arg0: i32) -> (i32, i32, i32) {
    %c0_i32 = arith.constant 0 : i32
    %c0_i32_0 = arith.constant 0 : i32
    %c0_i32_1 = arith.constant 0 : i32
    return %arg0, %c0_i32, %c0_i32_0 : i32, i32, i32
  }
}

</mosaic_0001>

<bundles_post_ra>
// kernel: transformer_encoder.1
= control target key start
LH: loop header
LB: loop body
LE: loop exit
PB: predicated region body
PF: predicated region fallthrough
CT: control target
= control target key end

     0   :  { %s3487_s0 = inlined_call_operand.vmem [shape: f32[2,8,32], index: 0, kind: input, shape index: {}]   ;;  %s3488_s1 = inlined_call_operand.vmem [shape: f32[1,32], index: 1, kind: input, shape index: {}]   ;;  %s3489_s2 = inlined_call_operand.vmem [shape: f32[1,32], index: 2, kind: input, shape index: {}]   ;;  %s3490_s3 = inlined_call_operand.vmem [shape: f32[1,32], index: 3, kind: input, shape index: {}]   ;;  %s3491_s4 = inlined_call_operand.vmem [shape: f32[1,32], index: 4, kind: input, shape index: {}]   ;;  %s3492_s5 = inlined_call_operand.vmem [shape: bf16[96,32], index: 5, kind: input, shape index: {}]   ;;  %s3493_s6 = inlined_call_operand.vmem [shape: bf16[160,32], index: 6, kind: input, shape index: {}]   ;;  %s3494_s7 = inlined_call_operand.vmem [shape: f32[1,32], index: 7, kind: input, shape index: {}]   ;;  %s3495_s8 = inlined_call_operand.vmem [shape: bf16[32,96], index: 8, kind: input, shape index: {}]   ;;  %s3496_s9 = inlined_call_operand.vmem [shape: f32[1,96], index: 9, kind: input, shape index: {}]   ;;  %s3497_s10 = inlined_call_operand.vmem [shape: bf16[32,32], index: 10, kind: input, shape index: {}]   ;;  %s3498_s11 = inlined_call_operand.vmem [shape: f32[1,32], index: 11, kind: input, shape index: {}]   ;;  %s3499_s12 = inlined_call_operand.vmem [shape: bf16[32,64], index: 12, kind: input, shape index: {}]   ;;  %s3500_s13 = inlined_call_operand.vmem [shape: f32[1,64], index: 13, kind: input, shape index: {}]   ;;  %s3501_s14 = inlined_call_operand.vmem [shape: bf16[64,32], index: 14, kind: input, shape index: {}]   ;;  %s3502_s15 = inlined_call_operand.vmem [shape: f32[1,32], index: 15, kind: input, shape index: {}]   ;;  %s3503_s16 = inlined_call_operand.hbm [shape: f32[2,8,32], index: 16, kind: output, shape index: {}]  }
   0x1   :  { %3507 = sst [smem:[#allocation9_spill]] %s3487_s0 }
   0x2   :  { %3508 = sst [smem:[#allocation10_spill]] %s3488_s1 }
   0x3   :  { %3509 = sst [smem:[#allocation11_spill]] %s3489_s2 }
   0x4   :  { %21 = vsyncpa [#allocation4], 0 }
   0x5   :  { %23 = vsyncpa [#allocation4 + $0x1], 0  ;;  %s3068_s21 = smov 0   ;;  %s3070_s22 = smov 0  }
   0x6   :  { %s3072_s23 = smov 0   ;;  %s3074_s24 = smov 0  }
   0x7 LB: > { %3510 = sst [smem:[#allocation6_spill]] %s2963_s23  ;;  %s3089_s25 = sadd.s32 4294967295, %s2967_s24   ;;  %s2967_s24 = sphi %s3074_s24, %s3518_s24   ;;  %s2963_s23 = sphi %s3072_s23, %s3520_s23   ;;  %s2959_s22 = sphi %s3070_s22, %s3522_s22   ;;  %s2955_s21 = sphi %s3068_s21, %s3521_s21  }
   0x8   : > { %s2415_s26 = sadd.s32 4294967294, %s2967_s24   ;;  %s3093_s27 = sadd.s32 1, %s2967_s24  }
   0x9   : > { %3511 = sst [smem:[#allocation7_spill]] %s3093_s27  ;;  %s377_s28 = sadd.s32 1, %s2963_s23 }
   0xa   : > { %s374_s29 = ssub.s32 %s2967_s24, %s3093_s27  ;;  %p387_p0 = scmp.ne.s32.totalorder %s2963_s23, %s2959_s22 }
   0xb   : > { %p375_p1 = scmp.eq.s32.totalorder %s374_s29, 0  ;;  %p388_p2 = scmp.eq.s32.totalorder %s3089_s25, 1 }
   0xc   : > { %p393_p3 = scmp.ne.s32.totalorder %s2959_s22, %s2955_s21  ;;  %p394_p4 = scmp.eq.s32.totalorder %s2415_s26, 1 }
   0xd   : > { %s3104_s30 = scalar_select %p375_p1, %s2963_s23, %s377_s28  }
   0xe   : > { %p3106_p5 = por %p388_p2, %p387_p0  ;;  %p3110_p6 = por %p394_p4, %p393_p3 }
   0xf   : > { %3512 = sst [smem:[#allocation8_spill]] %s3104_s30  ;;  %p2418_p7 = scmp.ge.s32.totalorder %s2967_s24, 1 }
  0x10   : > { %p464_p8 = scmp.lt.s32.totalorder %s2967_s24, 3 }
  0x12   : > { %p465_p9 = pnand %p2418_p7, %p464_p8 }
  0x13   : > { %p513_p10 = scmp.lt.s32.totalorder (!%p465_p9), %s3089_s25, 1  ;;  %vm519_vm0 = vcmask (!%p465_p9), 261120   ;;  %s3515_s28 = sld [smem:[#allocation9_spill]] (!%p465_p9)  ;;  %v2969_v2 = vmov (!%p465_p9), 0.0   ;;  %v2844_v8 = vld [vmem:[%s3492_s5 + $0x10] sm:$0xff] (!%p465_p9)   ;;  %v2845_v9 = vld [vmem:[%s3492_s5 + $0x20] sm:$0xff] (!%p465_p9)  }
  0x14   : > { %468 = sbr.rel (%p465_p9) target bundleno = 4006 (0xfa6), region = 84  ;;  %551 = vst.msk [vmem:[#allocation2 + $0x8] sm:$0xff] (!%p465_p9), %vm519_vm0, %v2969_v2  ;;  %550 = vst.msk [vmem:[#allocation2] sm:$0xff] (!%p465_p9), %vm519_vm0, %v2969_v2  ;;  %2564 = vmatprep.subr.bf16.mxu1 (!%p465_p9), %v2969_v2  ;;  %2580 = vmatprep.subr.bf16.mxu0 (!%p465_p9), %v2969_v2  ;;  %vm2970_vm1 = vmmov (!%p465_p9), 0   ;;  %v2846_v10 = vld [vmem:[%s3492_s5 + $0x18] sm:$0xff] (!%p465_p9)   ;;  %v2847_v11 = vld [vmem:[%s3492_s5 + $0x28] sm:$0xff] (!%p465_p9)  }
  0x15   : > { %552 = vst.msk [vmem:[#allocation2 + $0x10] sm:$0xff] (!%p465_p9), %vm519_vm0, %v2969_v2  ;;  %2568 = vmatprep.mubr.msk.bf16.mxu1 (!%p465_p9), %vm2970_vm1, %v2969_v2  ;;  %2584 = vmatprep.mubr.msk.bf16.mxu0 (!%p465_p9), %vm2970_vm1, %v2969_v2  ;;  %s3516_s1 = sld [smem:[#allocation10_spill]] (!%p465_p9)  ;;  %s3517_s2 = sld [smem:[#allocation11_spill]] (!%p465_p9)  ;;  %v2848_v21 = vld [vmem:[%s3492_s5] sm:$0xff] (!%p465_p9)   ;;  %v2850_v27 = vld [vmem:[%s3492_s5 + $0x8] sm:$0xff] (!%p465_p9)   ;;  %v2852_v31 = vld [vmem:[%s3493_s6 + $0x10] sm:$0xff] (!%p465_p9)  }
  0x16   : > { %2565 = vmatpush3.bf16.msra.mxu1 (!%p465_p9), %v2844_v8  ;;  %2581 = vmatpush3.bf16.msra.mxu0 (!%p465_p9), %v2845_v9  ;;  %v2849_v24 = vld [vmem:[%s3493_s6] sm:$0xff] (!%p465_p9)   ;;  %v2851_v28 = vld [vmem:[%s3493_s6 + $0x8] sm:$0xff] (!%p465_p9)   ;;  %v2853_v32 = vld [vmem:[%s3493_s6 + $0x30] sm:$0xff] (!%p465_p9)   ;;  %s2971_s23 = smov (!%p465_p9), 120   ;;  %s2972_s20 = smov (!%p465_p9), 96   ;;  %vm1109_vm2 = vcmask (!%p465_p9), 64512  }
  0x17   : > { %2566 = vmatprep.subr.bf16.mxu1 (!%p465_p9), %v2969_v2  ;;  %2582 = vmatprep.subr.bf16.mxu0 (!%p465_p9), %v2969_v2  ;;  %v2854_v35 = vld [vmem:[%s3493_s6 + $0x18] sm:$0xff] (!%p465_p9)   ;;  %v2856_v37 = vld [vmem:[%s3493_s6 + $0x20] sm:$0xff] (!%p465_p9)   ;;  %v2858_v39 = vld [vmem:[%s3493_s6 + $0x28] sm:$0xff] (!%p465_p9)   ;;  %s2975_s30 = smov (!%p465_p9), 80   ;;  %vm1233_vm3 = vcmask (!%p465_p9), 1043456   ;;  %s2981_s27 = smov (!%p465_p9), 40  }
  0x18   : > { %v2855_v36 = vld [vmem:[%s3493_s6 + $0x38] sm:$0xff] (!%p465_p9)   ;;  %v2857_v38 = vld [vmem:[%s3495_s8] sm:$0xff] (!%p465_p9)   ;;  %v2859_v40 = vld [vmem:[%s3495_s8 + $0x8] sm:$0xff] (!%p465_p9)   ;;  %vm2296_vm4 = vcmask (!%p465_p9), 523264  }
  0x19   : > { %v2860_v41 = vld [vmem:[%s3493_s6 + $0x40] sm:$0xff] (!%p465_p9)   ;;  %v2861_v43 = vld [vmem:[%s3493_s6 + $0x48] sm:$0xff] (!%p465_p9)  }
  0x1a   : > { %2567 = vmatpush3.bf16.msra.mxu1 (!%p465_p9), %v2846_v10  ;;  %2583 = vmatpush3.bf16.msra.mxu0 (!%p465_p9), %v2847_v11  ;;  %v2448_v10 = vld [vmem:[%s3496_s9] ss:$0 sm:$0xff] (!%p465_p9) }
  0x1b   : > { %s514_s18 = scalar_select %p513_p10, %s3089_s25, 1  ;;  %2572 = vmatprep.subr.bf16.mxu1 %v2969_v2  ;;  %2596 = vmatprep.subr.bf16.mxu0 %v2969_v2  ;;  %v2421_v16 = vld [vmem:[%s3516_s1] ss:$0 sm:$0xff] }
  0x1c   : > { %v2422_v18 = vld [vmem:[%s3517_s2] ss:$0 sm:$0xff] }
  0x1d   : > { %s2420_s19 = sshll.u32 %s514_s18, 3  ;;  %s2974_s18 = smov 64  }
  0x1e   : > { %s3121_s29 = scalar_lea.vmem %s3515_s28, %s2420_s19  ;;  %s2973_s28 = smov 88  }
  0x1f   : > { %v518_v0 = vld [vmem:[%s3121_s29] sm:$0xff]  ;;  %s2976_s19 = smov 112  }
  0x20   : > { %v520_v1 = vsel %vm519_vm0, %v518_v0, 0.0 }
  0x21   : > { %521 = vadd.xlane.f32.xlu0 %v520_v1 }
  0xae   : > { %v522_v3 = vpop.xlane.xlu0 %521 }
  0xaf   : > { %v524_v4 = vmul.f32 0.03125, %v522_v3 }
  0xb1   : > { %v525_v5 = vsub.f32 %v518_v0, %v524_v4 }
  0xb3   : > { %v526_v6 = vmul.f32 %v525_v5, %v525_v5 }
  0xb5   : > { %v527_v7 = vsel %vm519_vm0, %v526_v6, 0.0 }
  0xb6   : > { %528 = vadd.xlane.f32.xlu0 %v527_v7 }
 0x143   : > { %v529_v12 = vpop.xlane.xlu0 %528 }
 0x144   : > { %v530_v13 = vmul.f32 0.03125, %v529_v12 }
 0x146   : > { %v531_v14 = vadd.f32 1e-05, %v530_v13 }
 0x148   : > { %2868 = vrsqrt.f32 %v531_v14 }
 0x152   : > { %v2869_v15 = vpop.eup %2868 }
 0x153   : > { %v533_v17 = vmul.f32 %v2869_v15, %v525_v5 }
 0x155   : > { %v541_v19 = vmul.f32 %v2421_v16, %v533_v17 }
 0x157   : > { %v549_v20 = vadd.f32 %v2422_v18, %v541_v19 }
 0x159   : > { %553 = vst.msk [vmem:[#allocation2 + $0x8] sm:$0xff] %vm519_vm0, %v549_v20  ;;  %v1044_v42 = vpack.c.bf16 %v549_v20, %v549_v20 }
 0x160   : > { %v560_v22 = vld [vmem:[#allocation2 + $0x8] sm:$0xff] }
 0x161   : > { %v676_v23 = vld [vmem:[#allocation2 + $0x9] sm:$0xff]  ;;  %v565_v25 = vpack.c.bf16 %v560_v22, %v560_v22 }
 0x162   : > { %v681_v26 = vpack.c.bf16 %v676_v23, %v676_v23  ;;  %v554_v29 = vld [vmem:[#allocation2 + $0x7] sm:$0xff] }
 0x163   : > { %2569 = vmatmul.mubr.msk.bf16.vlgmr.msra.gmra.mrb[0].mxu1 %vm519_vm0, %v565_v25  ;;  %v738_v30 = vld [vmem:[#allocation2 + $0x6] sm:$0xff]  ;;  %v559_v33 = vpack.c.bf16 %v554_v29, %v554_v29 }
 0x164   : > { %2585 = vmatmul.mubr.msk.bf16.vlgmr.msra.gmra.mrb[0].mxu0 %vm519_vm0, %v681_v26  ;;  %2573 = vmatpush3.bf16.msra.mxu1 %v2848_v21  ;;  %v743_v34 = vpack.c.bf16 %v738_v30, %v738_v30  ;;  %v969_v44 = vld [vmem:[#allocation2 + $0xa] sm:$0xff] }
 0x165   : > { %2597 = vmatpush3.bf16.msra.mxu0 %v2849_v24  ;;  %2574 = vmatprep.subr.bf16.mxu1 %v2969_v2  ;;  %v974_v45 = vpack.c.bf16 %v969_v44, %v969_v44 }
 0x166   : > { %2598 = vmatprep.subr.bf16.mxu0 %v2969_v2  ;;  %2576 = vmatprep.mubr.msk.bf16.mxu1 %vm2970_vm1, %v2969_v2 }
 0x167   : > { %2600 = vmatprep.mubr.msk.bf16.mxu0 %vm2970_vm1, %v2969_v2 }
 0x168   : > { %2575 = vmatpush3.bf16.msra.mxu1 %v2850_v27 }
 0x169   : > { %2599 = vmatpush3.bf16.msra.mxu0 %v2851_v28  ;;  %2588 = vmatprep.subr.bf16.mxu1 %v2969_v2 }
 0x16a   : > { %2612 = vmatprep.subr.bf16.mxu0 %v2969_v2 }
 0x16b   : > { %2577 = vmatmul.mubr.msk.bf16.vlgmr.msra.gmra.mrb[4].mxu1 %vm519_vm0, %v559_v33 }
 0x16c   : > { %2601 = vmatmul.mubr.msk.bf16.vlgmr.msra.gmra.mrb[4].mxu0 %vm519_vm0, %v743_v34  ;;  %2589 = vmatpush3.bf16.msra.mxu1 %v2852_v31 }
 0x16d   : > { %2613 = vmatpush3.bf16.msra.mxu0 %v2853_v32  ;;  %2590 = vmatprep.subr.bf16.mxu1 %v2969_v2 }
 0x16e   : > { %2614 = vmatprep.subr.bf16.mxu0 %v2969_v2  ;;  %2592 = vmatprep.mubr.msk.bf16.mxu1 %vm2970_vm1, %v2969_v2 }
 0x16f   : > { %2616 = vmatprep.mubr.msk.bf16.mxu0 %vm2970_vm1, %v2969_v2 }
 0x170   : > { %2591 = vmatpush3.bf16.msra.mxu1 %v2854_v35 }
 0x171   : > { %2615 = vmatpush3.bf16.msra.mxu0 %v2855_v36  ;;  %2604 = vmatprep.subr.bf16.mxu1 %v2969_v2 }
 0x172   : > { %2628 = vmatprep.subr.bf16.mxu0 %v2969_v2 }
 0x173   : > { %2593 = vmatmul.mubr.msk.bf16.vlgmr.msra.gmra.mrb[8].mxu1 %vm519_vm0, %v559_v33 }
 0x174   : > { %2617 = vmatmul.mubr.msk.bf16.vlgmr.msra.gmra.mrb[8].mxu0 %vm519_vm0, %v681_v26  ;;  %2605 = vmatpush3.bf16.msra.mxu1 %v2856_v37  ;;  %v2447_v26 = vld [vmem:[%s3494_s7] ss:$0 sm:$0xff] }
 0x175   : > { %2629 = vmatpush3.bf16.msra.mxu0 %v2857_v38  ;;  %2606 = vmatprep.subr.bf16.mxu1 %v2969_v2 }
 0x176   : > { %2630 = vmatprep.subr.bf16.mxu0 %v2969_v2  ;;  %2608 = vmatprep.mubr.msk.bf16.mxu1 %vm2970_vm1, %v2969_v2 }
 0x177   : > { %2632 = vmatprep.mubr.msk.bf16.mxu0 %vm2970_vm1, %v2969_v2 }
 0x178   : > { %2607 = vmatpush3.bf16.msra.mxu1 %v2858_v39 }
 0x179   : > { %2631 = vmatpush3.bf16.msra.mxu0 %v2859_v40  ;;  %2620 = vmatprep.subr.bf16.mxu1 %v2969_v2 }
 0x17a   : > { %2642 = vmatprep.subr.bf16.mxu0 %v2969_v2 }
 0x17b   : > { %2609 = vmatmul.mubr.msk.bf16.vlgmr.msra.gmra.mrb[12].mxu1 %vm519_vm0, %v565_v25 }
 0x17c   : > { %2633 = vmatmul.mubr.msk.bf16.vlgmr.msra.gmra.mrb[12].mxu0 %vm519_vm0, %v1044_v42  ;;  %2621 = vmatpush3.bf16.msra.mxu1 %v2860_v41 }
 0x17d   : > { %2624 = vmatprep.mubr.msk.bf16.mxu1 %vm2970_vm1, %v2969_v2  ;;  %2622 = vmatprep.subr.bf16.mxu1 %v2969_v2 }
 0x17e   : > { %2644 = vmatprep.mubr.msk.bf16.mxu0 %vm2970_vm1, %v2969_v2 }
 0x180   : > { %2623 = vmatpush3.bf16.msra.mxu1 %v2861_v43 }
 0x181   : > { %2636 = vmatprep.subr.bf16.mxu1 %v2969_v2 }
 0x183   : > { %2625 = vmatmul.mubr.msk.bf16.vlgmr.msra.gmra.mrb[16].mxu1 %vm519_vm0, %v974_v45 }
 0x184   : > { %2638 = vmatprep.mubr.msk.bf16.mxu1 %vm2970_vm1, %v2969_v2 }
 0x236   : > { %v615_v46 = vpop.f32.mrb[0].mxu1 }
 0x237   : > { %v731_v47 = vpop.f32.mrb[0].mxu0  ;;  %v2570_v48 = vpop.f32.mrb[1].mxu1 }
 0x238   : > { %v2586_v49 = vpop.f32.mrb[1].mxu0  ;;  %v618_v50 = vpop.f32.mrb[2].mxu1 }
 0x239   : > { %v734_v51 = vpop.f32.mrb[2].mxu0  ;;  %v2571_v52 = vpop.f32.mrb[3].mxu1 }
 0x23a   : > { %v2587_v53 = vpop.f32.mrb[3].mxu0 }
 0x23e   : > { %v670_v54 = vpop.f32.mrb[4].mxu1 }
 0x23f   : > { %v849_v55 = vpop.f32.mrb[4].mxu0  ;;  %v671_v56 = vadd.f32 %v670_v54, %v615_v46  ;;  %v2578_v57 = vpop.f32.mrb[5].mxu1 }
 0x240   : > { %v2602_v58 = vpop.f32.mrb[5].mxu0  ;;  %v673_v59 = vpop.f32.mrb[6].mxu1 }
 0x241   : > { %v852_v60 = vpop.f32.mrb[6].mxu0  ;;  %v737_v61 = vadd.f32 %v731_v47, %v671_v56  ;;  %v2579_v62 = vpop.f32.mrb[7].mxu1 }
 0x242   : > { %v2603_v63 = vpop.f32.mrb[7].mxu0 }
 0x246   : > { %v794_v0 = vpop.f32.mrb[8].mxu1 }
 0x247   : > { %v962_v1 = vpop.f32.mrb[8].mxu0  ;;  %v850_v3 = vadd.f32 %v849_v55, %v794_v0  ;;  %v2594_v4 = vpop.f32.mrb[9].mxu1 }
 0x248   : > { %v2618_v5 = vpop.f32.mrb[9].mxu0  ;;  %v797_v6 = vpop.f32.mrb[10].mxu1 }
 0x249   : > { %v965_v7 = vpop.f32.mrb[10].mxu0  ;;  %v2595_v8 = vpop.f32.mrb[11].mxu1 }
 0x24a   : > { %v2619_v9 = vpop.f32.mrb[11].mxu0 }
 0x24e   : > { %v905_v11 = vpop.f32.mrb[12].mxu1 }
 0x24f   : > { %v1101_v12 = vpop.f32.mrb[12].mxu0  ;;  %v911_v13 = vadd.f32 %v905_v11, %v850_v3  ;;  %v2610_v15 = vpop.f32.mrb[13].mxu1 }
 0x250   : > { %v1102_v14 = vadd.f32 %v2448_v10, %v1101_v12  ;;  %v2634_v16 = vpop.f32.mrb[13].mxu0  ;;  %v908_v17 = vpop.f32.mrb[14].mxu1 }
 0x251   : > { %v1104_v18 = vpop.f32.mrb[14].mxu0  ;;  %v2611_v20 = vpop.f32.mrb[15].mxu1  ;;  %v968_v22 = vadd.f32 %v962_v1, %v911_v13 }
 0x252   : > { %v3247_v19 = vpack.c.bf16 %v1102_v14, %v1102_v14  ;;  %v2635_v21 = vpop.f32.mrb[15].mxu0 }
 0x254   : > { %1322 = vrot.lane.b32.xlu0 %v3247_v19, %s2971_s23  ;;  %1170 = vrot.lane.b32.xlu1 %v3247_v19, %s2972_s20  ;;  %s2982_s20 = smov [#allocation3]  }
 0x256   : > { %v1024_v23 = vpop.f32.mrb[16].mxu1 }
 0x257   : > { %v1030_v24 = vadd.f32 %v1024_v23, %v968_v22  ;;  %v2626_v25 = vpop.f32.mrb[17].mxu1 }
 0x258   : > { %v1027_v27 = vpop.f32.mrb[18].mxu1 }
 0x259   : > { %v1031_v28 = vadd.f32 %v1030_v24, %v737_v61  ;;  %v2627_v29 = vpop.f32.mrb[19].mxu1 }
 0x25b   : > { %v1039_v30 = vadd.f32 %v2447_v26, %v1031_v28 }
 0x25d   : > { %v3254_v31 = vpack.c.bf16 %v1039_v30, %v1039_v30 }
 0x25f   : > { %1325 = vrot.lane.b32.xlu1 %v3254_v31, %s2971_s23  ;;  %v1114_v32 = vsel %vm1109_vm2, %v3254_v31, 0  ;;  %s2977_s23 = smov 56  }
 0x260   : > { %2637 = vmatpush3.bf16.xpose.msra.mxu1 %v1114_v32 }
 0x261   : > { %2648 = vmatprep.subr.bf16.mxu1 %v2969_v2 }
 0x263   : > { %1386 = vrot.lane.b32.xlu1 %v3247_v19, %s2973_s28 }
 0x267   : > { %2639 = vmatmul.mubr.msk.bf16.vlgmr.msra.gmra.mrb[20].mxu1 %vm1109_vm2, %v3247_v19 }
 0x268   : > { %2650 = vmatprep.mubr.msk.bf16.mxu1 %vm2970_vm1, %v2969_v2 }
 0x2c6   : > { %v1171_v33 = vpop.permute.xlu1 %1170  ;;  %v1323_v38 = vpop.permute.xlu0 %1322 }
 0x2c7   : > { %v1173_v34 = vsel %vm1109_vm2, %v1171_v33, 0 }
 0x2c8   : > { %2643 = vmatpush3.bf16.xpose.msra.mxu0 %v1173_v34 }
 0x2c9   : > { %2660 = vmatprep.subr.bf16.mxu0 %v2969_v2 }
 0x2cf   : > { %2645 = vmatmul.mubr.msk.bf16.vlgmr.msra.gmra.mrb[16].mxu0 %vm1109_vm2, %v3247_v19 }
 0x2d0   : > { %2662 = vmatprep.mubr.msk.bf16.mxu0 %vm2970_vm1, %v2969_v2 }
 0x2d1   : > { %v1326_v35 = vpop.permute.xlu1 %1325 }
 0x2d2   : > { %v1331_v36 = vsel %vm1109_vm2, %v1326_v35, 0 }
 0x2d3   : > { %2661 = vmatpush3.bf16.xpose.msra.mxu0 %v1331_v36 }
 0x2d4   : > { %2666 = vmatprep.subr.bf16.mxu0 %v2969_v2 }
 0x2d5   : > { %v1387_v37 = vpop.permute.xlu1 %1386 }
 0x2d6   : > { %v1389_v39 = vsel %vm1109_vm2, %v1387_v37, 0 }
 0x2da   : > { %2663 = vmatmul.mubr.msk.bf16.vlgmr.msra.gmra.mrb[20].mxu0 %vm1109_vm2, %v1323_v38 }
 0x2db   : > { %2667 = vmatpush3.bf16.xpose.msra.mxu0 %v1389_v39  ;;  %2668 = vmatprep.mubr.msk.bf16.mxu0 %vm2970_vm1, %v2969_v2 }
 0x2dc   : > { %2684 = vmatprep.subr.bf16.mxu0 %v2969_v2 }
 0x2e2   : > { %2669 = vmatmul.mubr.msk.bf16.vlgmr.msra.gmra.mrb[24].mxu0 %vm1109_vm2, %v1323_v38 }
 0x2e3   : > { %2686 = vmatprep.mubr.msk.bf16.mxu0 %vm2970_vm1, %v2969_v2 }
 0x33a   : > { %v1150_v40 = vpop.f32.mrb[20].mxu1 }
 0x33b   : > { %v1156_v41 = vmul.f32 0.35355338, %v1150_v40  ;;  %v2640_v42 = vpop.f32.mrb[21].mxu1 }
 0x33c   : > { %v1153_v43 = vpop.f32.mrb[22].mxu1 }
 0x33d   : > { %v2641_v44 = vpop.f32.mrb[23].mxu1  ;;  %v1157_v45 = vsel %vm1109_vm2, %v1156_v41, -inf }
 0x33e   : > { %1158 = vmax.xlane.f32.xlu0 %v1157_v45 }
 0x3a2   : > { %v1209_v46 = vpop.f32.mrb[16].mxu0 }
 0x3a3   : > { %v1215_v47 = vmul.f32 0.35355338, %v1209_v46  ;;  %v2646_v48 = vpop.f32.mrb[17].mxu0 }
 0x3a4   : > { %v1212_v49 = vpop.f32.mrb[18].mxu0 }
 0x3a5   : > { %v2647_v50 = vpop.f32.mrb[19].mxu0  ;;  %v1216_v51 = vsel %vm1109_vm2, %v1215_v47, -inf }
 0x3a6   : > { %1217 = vmax.xlane.f32.xlu1 %v1216_v51 }
 0x3ad   : > { %v1367_v52 = vpop.f32.mrb[20].mxu0 }
 0x3ae   : > { %v2664_v53 = vpop.f32.mrb[21].mxu0  ;;  %v1373_v60 = vmul.f32 0.35355338, %v1367_v52 }
 0x3af   : > { %v1370_v54 = vpop.f32.mrb[22].mxu0  ;;  %v1320_v53 = vld [vmem:[%s3497_s10] sm:$0xf] }
 0x3b0   : > { %v2665_v55 = vpop.f32.mrb[23].mxu0  ;;  %v1374_v63 = vsel %vm1109_vm2, %v1373_v60, -inf }
 0x3b5   : > { %v1425_v56 = vpop.f32.mrb[24].mxu0 }
 0x3b6   : > { %v1431_v57 = vmul.f32 0.35355338, %v1425_v56  ;;  %v2670_v58 = vpop.f32.mrb[25].mxu0 }
 0x3b7   : > { %v1428_v59 = vpop.f32.mrb[26].mxu0 }
 0x3b8   : > { %v2671_v61 = vpop.f32.mrb[27].mxu0  ;;  %v1432_v62 = vsel %vm1109_vm2, %v1431_v57, -inf }
 0x3b9   : > { %1433 = vmax.xlane.f32.xlu1 %v1432_v62 }
 0x3bd   : > { %1375 = vmax.xlane.f32.xlu1 %v1374_v63 }
 0x3cb   : > { %v1159_v0 = vpop.xlane.xlu0 %1158 }
 0x3cc   : > { %v1160_v1 = vsub.f32 %v1156_v41, %v1159_v0 }
 0x3ce   : > { %v1161_v3 = vmul.f32 1.442695, %v1160_v1 }
 0x3d0   : > { %2870 = vpow2.f32 %v1161_v3 }
 0x3da   : > { %v2871_v4 = vpop.eup %2870 }
 0x3db   : > { %v1163_v5 = vsel %vm1109_vm2, %v2871_v4, 0.0 }
 0x3dc   : > { %1164 = vadd.xlane.f32.xlu1 %v1163_v5 }
 0x433   : > { %v1218_v6 = vpop.xlane.xlu1 %1217 }
 0x434   : > { %v1219_v7 = vsub.f32 %v1215_v47, %v1218_v6  ;;  %v1535_v47 = vld [vmem:[%s3497_s10 + $0x4] sm:$0xf] }
 0x435   : > { %v1541_v48 = vsel %vm1233_vm3, %v1535_v47, 0 }
 0x436   : > { %v1220_v8 = vmul.f32 1.442695, %v1219_v7  ;;  %2685 = vmatpush3.bf16.msra.mxu0 %v1541_v48 }
 0x437   : > { %2690 = vmatprep.subr.bf16.mxu0 %v2969_v2 }
 0x438   : > { %2872 = vpow2.f32 %v1220_v8 }
 0x442   : > { %v2873_v9 = vpop.eup %2872 }
 0x443   : > { %v1222_v10 = vsel %vm1109_vm2, %v2873_v9, 0.0 }
 0x444   : > { %1223 = vadd.xlane.f32.xlu1 %v1222_v10 }
 0x446   : > { %v1434_v11 = vpop.xlane.xlu1 %1433 }
 0x447   : > { %v1435_v12 = vsub.f32 %v1431_v57, %v1434_v11  ;;  %v1587_v57 = vsel %vm1233_vm3, %v1320_v53, 0 }
 0x449   : > { %v1436_v15 = vmul.f32 1.442695, %v1435_v12 }
 0x44a   : > { %v1376_v13 = vpop.xlane.xlu1 %1375 }
 0x44b   : > { %v1377_v14 = vsub.f32 %v1373_v60, %v1376_v13 }
 0x44d   : > { %v1378_v16 = vmul.f32 1.442695, %v1377_v14 }
 0x44f   : > { %2874 = vpow2.f32 %v1378_v16 }
 0x450   : > { %2876 = vpow2.f32 %v1436_v15 }
 0x455   : > { %1228 = vrot.lane.b32.xlu1 %v3247_v19, %s2974_s18  ;;  %s2978_s18 = smov 48  }
 0x459   : > { %1692 = vrot.lane.b32.xlu1 %v3247_v19, %s2975_s30  ;;  %v2875_v17 = vpop.eup %2874  ;;  %s2979_s30 = smov 104  }
 0x45a   : > { %v1380_v18 = vsel %vm1109_vm2, %v2875_v17, 0.0  ;;  %v2877_v20 = vpop.eup %2876 }
 0x45b   : > { %1381 = vadd.xlane.f32.xlu0 %v1380_v18  ;;  %v1438_v21 = vsel %vm1109_vm2, %v2877_v20, 0.0 }
 0x45d   : > { %1629 = vrot.lane.b32.xlu1 %v3247_v19, %s2976_s19 }
 0x45f   : > { %1439 = vadd.xlane.f32.xlu0 %v1438_v21 }
 0x461   : > { %1631 = vrot.lane.b32.xlu1 %v3254_v31, %s2976_s19  ;;  %s2980_s19 = smov 72  }
 0x469   : > { %v1165_v22 = vpop.xlane.xlu1 %1164 }
 0x475   : > { %1444 = vrot.lane.b32.xlu0 %v3247_v19, %s2977_s23 }
 0x4d1   : > { %v1224_v23 = vpop.xlane.xlu1 %1223 }
 0x4d2   : > { %2878 = vrcp.f32 %v1224_v23 }
 0x4d3   : > { %2880 = vrcp.f32 %v1165_v22 }
 0x4d5   : > { %v1229_v24 = vpop.permute.xlu1 %1228 }
 0x4d6   : > { %v1235_v25 = vsel %vm1233_vm3, %v1229_v24, 0 }
 0x4d7   : > { %2649 = vmatpush3.bf16.msra.mxu1 %v1235_v25 }
 0x4d8   : > { %2654 = vmatprep.subr.bf16.mxu1 %v2969_v2 }
 0x4d9   : > { %v1693_v39 = vpop.permute.xlu1 %1692 }
 0x4dc   : > { %v2879_v26 = vpop.eup %2878 }
 0x4dd   : > { %v1226_v27 = vmul.f32 %v2879_v26, %v2873_v9  ;;  %v2881_v29 = vpop.eup %2880  ;;  %v1630_v42 = vpop.permute.xlu1 %1629 }
 0x4de   : > { %v1167_v30 = vmul.f32 %v2881_v29, %v2871_v4  ;;  %v1695_v4 = vsel %vm1109_vm2, %v1693_v39, 0 }
 0x4df   : > { %v1227_v28 = vpack.c.bf16 %v1226_v27, %v1226_v27 }
 0x4e0   : > { %v1168_v33 = vpack.c.bf16 %v1167_v30, %v1167_v30 }
 0x4e1   : > { %2651 = vmatmul.mubr.msk.bf16.vlgmr.msra.gmra.mrb[24].mxu1 %vm1109_vm2, %v1227_v28  ;;  %v1632_v44 = vpop.permute.xlu1 %1631 }
 0x4e2   : > { %2655 = vmatpush3.bf16.msra.mxu1 %v1235_v25  ;;  %2656 = vmatprep.mubr.msk.bf16.mxu1 %vm2970_vm1, %v2969_v2  ;;  %v1637_v46 = vsel %vm1109_vm2, %v1632_v44, 0 }
 0x4e3   : > { %2672 = vmatprep.subr.bf16.mxu1 %v2969_v2 }
 0x4e8   : > { %v1382_v32 = vpop.xlane.xlu0 %1381 }
 0x4ec   : > { %v1440_v34 = vpop.xlane.xlu0 %1439 }
 0x4ed   : > { %2657 = vmatmul.mubr.msk.bf16.vlgmr.msra.gmra.mrb[24].mxu1 %vm1109_vm2, %v1168_v33  ;;  %2882 = vrcp.f32 %v1440_v34  ;;  %v1841_v33 = vld [vmem:[%s3497_s10 + $0x8] sm:$0xf] }
 0x4ee   : > { %2674 = vmatprep.mubr.msk.bf16.mxu1 %vm2970_vm1, %v2969_v2  ;;  %2884 = vrcp.f32 %v1382_v32  ;;  %v1847_v34 = vsel %vm1233_vm3, %v1841_v33, 0 }
 0x4f0   : > { %v1445_v35 = vpop.permute.xlu0 %1444 }
 0x4f1   : > { %v1450_v36 = vsel %vm1233_vm3, %v1445_v35, 0 }
 0x4f2   : > { %2673 = vmatpush3.bf16.msra.mxu1 %v1450_v36 }
 0x4f3   : > { %2678 = vmatprep.subr.bf16.mxu1 %v2969_v2 }
 0x4f7   : > { %v2883_v37 = vpop.eup %2882 }
 0x4f8   : > { %v1442_v38 = vmul.f32 %v2883_v37, %v2877_v20  ;;  %v2885_v41 = vpop.eup %2884 }
 0x4f9   : > { %v1384_v43 = vmul.f32 %v2885_v41, %v2875_v17 }
 0x4fa   : > { %v1443_v40 = vpack.c.bf16 %v1442_v38, %v1442_v38 }
 0x4fb   : > { %v1385_v45 = vpack.c.bf16 %v1384_v43, %v1384_v43 }
 0x4fc   : > { %2675 = vmatmul.mubr.msk.bf16.vlgmr.msra.gmra.mrb[28].mxu1 %vm1109_vm2, %v1443_v40 }
 0x4fd   : > { %2679 = vmatpush3.bf16.msra.mxu1 %v1450_v36  ;;  %2680 = vmatprep.mubr.msk.bf16.mxu1 %vm2970_vm1, %v2969_v2 }
 0x4fe   : > { %2696 = vmatprep.subr.bf16.mxu1 %v2969_v2 }
 0x508   : > { %2681 = vmatmul.mubr.msk.bf16.vlgmr.msra.gmra.mrb[28].mxu1 %vm1109_vm2, %v1385_v45 }
 0x509   : > { %2697 = vmatpush3.bf16.xpose.msra.mxu1 %v1637_v46  ;;  %2698 = vmatprep.mubr.msk.bf16.mxu1 %vm2970_vm1, %v2969_v2 }
 0x50a   : > { %2708 = vmatprep.subr.bf16.mxu1 %v2969_v2 }
 0x510   : > { %2699 = vmatmul.mubr.msk.bf16.vlgmr.msra.gmra.mrb[32].mxu1 %vm1109_vm2, %v1630_v42 }
 0x511   : > { %2710 = vmatprep.mubr.msk.bf16.mxu1 %vm2970_vm1, %v2969_v2 }
 0x5c0   : > { %v1314_v49 = vpop.f32.mrb[24].mxu1 }
 0x5c1   : > { %v2658_v50 = vpop.f32.mrb[25].mxu1  ;;  %v1321_v61 = vpack.c.bf16 %v1314_v49, %v1314_v49 }
 0x5c2   : > { %v1317_v51 = vpop.f32.mrb[26].mxu1 }
 0x5c3   : > { %v2659_v52 = vpop.f32.mrb[27].mxu1 }
 0x5db   : > { %v1529_v54 = vpop.f32.mrb[28].mxu1 }
 0x5dc   : > { %v1536_v55 = vpack.c.bf16 %v1529_v54, %v1529_v54  ;;  %v2682_v56 = vpop.f32.mrb[29].mxu1 }
 0x5dd   : > { %v1532_v58 = vpop.f32.mrb[30].mxu1 }
 0x5de   : > { %v2683_v59 = vpop.f32.mrb[31].mxu1  ;;  %2687 = vmatmul.mubr.msk.bf16.vlgmr.msra.gmra.mrb[28].mxu0 %vm1109_vm2, %v1536_v55 }
 0x5df   : > { %2691 = vmatpush3.bf16.msra.mxu0 %v1587_v57  ;;  %2692 = vmatprep.mubr.msk.bf16.mxu0 %vm2970_vm1, %v2969_v2 }
 0x5e0   : > { %2702 = vmatprep.subr.bf16.mxu0 %v2969_v2 }
 0x5e3   : > { %v1673_v60 = vpop.f32.mrb[32].mxu1 }
 0x5e4   : > { %v1679_v62 = vmul.f32 0.35355338, %v1673_v60  ;;  %v2700_v63 = vpop.f32.mrb[33].mxu1 }
 0x5e5   : > { %v1676_v0 = vpop.f32.mrb[34].mxu1 }
 0x5e6   : > { %2693 = vmatmul.mubr.msk.bf16.vlgmr.msra.gmra.mrb[32].mxu0 %vm1109_vm2, %v1321_v61  ;;  %v2701_v1 = vpop.f32.mrb[35].mxu1  ;;  %v1680_v3 = vsel %vm1109_vm2, %v1679_v62, -inf }
 0x5e7   : > { %1681 = vmax.xlane.f32.xlu1 %v1680_v3  ;;  %2704 = vmatprep.mubr.msk.bf16.mxu0 %vm2970_vm1, %v2969_v2 }
 0x5e8   : > { %2703 = vmatpush3.bf16.xpose.msra.mxu0 %v1695_v4 }
 0x5e9   : > { %2720 = vmatprep.subr.bf16.mxu0 %v2969_v2 }
 0x5ef   : > { %2705 = vmatmul.mubr.msk.bf16.vlgmr.msra.gmra.mrb[36].mxu0 %vm1109_vm2, %v1630_v42 }
 0x5f0   : > { %2722 = vmatprep.mubr.msk.bf16.mxu0 %vm2970_vm1, %v2969_v2  ;;  %2721 = vmatpush3.bf16.msra.mxu0 %v1847_v34 }
 0x5f1   : > { %2726 = vmatprep.subr.bf16.mxu0 %v2969_v2 }
 0x5f8   : > { %1750 = vrot.lane.b32.xlu1 %v3247_v19, %s2978_s18 }
 0x5fc   : > { %1890 = vrot.lane.b32.xlu1 %v3247_v19, %s2979_s30 }
 0x600   : > { %1892 = vrot.lane.b32.xlu1 %v3254_v31, %s2979_s30 }
 0x674   : > { %v1682_v5 = vpop.xlane.xlu1 %1681 }
 0x675   : > { %v1683_v23 = vsub.f32 %v1679_v62, %v1682_v5 }
 0x677   : > { %v1684_v26 = vmul.f32 1.442695, %v1683_v23 }
 0x678   : > { %v1751_v6 = vpop.permute.xlu1 %1750 }
 0x679   : > { %v1756_v7 = vsel %vm1233_vm3, %v1751_v6, 0 }
 0x67a   : > { %2709 = vmatpush3.bf16.msra.mxu1 %v1756_v7 }
 0x67b   : > { %2714 = vmatprep.subr.bf16.mxu1 %v2969_v2 }
 0x67c   : > { %v1891_v45 = vpop.permute.xlu1 %1890 }
 0x680   : > { %v1893_v46 = vpop.permute.xlu1 %1892 }
 0x681   : > { %v1898_v51 = vsel %vm1109_vm2, %v1893_v46, 0 }
 0x6b1   : > { %v1577_v8 = vpop.f32.mrb[28].mxu0 }
 0x6b2   : > { %v2688_v9 = vpop.f32.mrb[29].mxu0 }
 0x6b3   : > { %v1580_v10 = vpop.f32.mrb[30].mxu0 }
 0x6b4   : > { %v2689_v11 = vpop.f32.mrb[31].mxu0 }
 0x6b9   : > { %v1623_v12 = vpop.f32.mrb[32].mxu0 }
 0x6ba   : > { %v3344_v13 = vadd.f32 %v1623_v12, %v1577_v8  ;;  %v2694_v14 = vpop.f32.mrb[33].mxu0 }
 0x6bb   : > { %v1626_v15 = vpop.f32.mrb[34].mxu0 }
 0x6bc   : > { %v2695_v16 = vpop.f32.mrb[35].mxu0 }
 0x6c2   : > { %v1731_v17 = vpop.f32.mrb[36].mxu0 }
 0x6c3   : > { %v1737_v18 = vmul.f32 0.35355338, %v1731_v17  ;;  %v2706_v31 = vpop.f32.mrb[37].mxu0 }
 0x6c4   : > { %v1734_v20 = vpop.f32.mrb[38].mxu0 }
 0x6c5   : > { %v2707_v21 = vpop.f32.mrb[39].mxu0  ;;  %v1738_v22 = vsel %vm1109_vm2, %v1737_v18, -inf }
 0x6c6   : > { %1739 = vmax.xlane.f32.xlu0 %v1738_v22  ;;  %v2102_v22 = vld [vmem:[%s3497_s10 + $0xc] sm:$0xf] }
 0x6c7   : > { %v2108_v23 = vsel %vm1233_vm3, %v2102_v22, 0 }
 0x753   : > { %v1740_v24 = vpop.xlane.xlu0 %1739 }
 0x754   : > { %v1741_v25 = vsub.f32 %v1737_v18, %v1740_v24 }
 0x756   : > { %v1742_v27 = vmul.f32 1.442695, %v1741_v25 }
 0x758   : > { %2886 = vpow2.f32 %v1742_v27 }
 0x759   : > { %2888 = vpow2.f32 %v1684_v26 }
 0x762   : > { %v2887_v28 = vpop.eup %2886 }
 0x763   : > { %v1744_v29 = vsel %vm1109_vm2, %v2887_v28, 0.0  ;;  %v2889_v30 = vpop.eup %2888 }
 0x764   : > { %1745 = vadd.xlane.f32.xlu0 %v1744_v29  ;;  %v1686_v32 = vsel %vm1109_vm2, %v2889_v30, 0.0 }
 0x768   : > { %1687 = vadd.xlane.f32.xlu0 %v1686_v32 }
 0x77e   : > { %1953 = vrot.lane.b32.xlu0 %v3247_v19, %s2980_s19  ;;  %s510_s19 = sand.u32 1, %s2959_s22  }
 0x77f   : > { %s2419_s23 = sshll.u32 %s510_s19, 3 }
 0x780   : > { %s512_s26 = scalar_lea.vmem [#allocation3], %s2419_s23 }
 0x781   : > { %s2356_s28 = sshll.u32 %s512_s26, 4  ;;  %s3446_s28 = int_to_ptr.vmem [resolvable:$true] %s2356_s28 }
 0x782   : > { %s2905_s23 = scalar_lea.vmem %s3446_s28, 128 }
 0x783   : > { %p2906_p11 = scmp.ne.s32.totalorder %s3446_s28, %s2905_s23 }
 0x785   : > { %p2907_p12 = pnand %p2906_p11, %p3106_p5 }
 0x787   : > { %p2908_p13 = pneg %p2907_p12 }
 0x7f1   : > { %v1746_v35 = vpop.xlane.xlu0 %1745 }
 0x7f2   : > { %2890 = vrcp.f32 %v1746_v35 }
 0x7f5   : > { %v1688_v36 = vpop.xlane.xlu0 %1687 }
 0x7f6   : > { %2892 = vrcp.f32 %v1688_v36 }
 0x7f9   : > { %v1954_v42 = vpop.permute.xlu0 %1953 }
 0x7fa   : > { %v1956_v44 = vsel %vm1109_vm2, %v1954_v42, 0 }
 0x7fc   : > { %v2891_v37 = vpop.eup %2890 }
 0x7fd   : > { %v1748_v38 = vmul.f32 %v2891_v37, %v2887_v28  ;;  %v2472_v37 = vld [vmem:[%s3498_s11] ss:$0 sm:$0xff] }
 0x7ff   : > { %v1749_v39 = vpack.c.bf16 %v1748_v38, %v1748_v38 }
 0x800   : > { %v2893_v40 = vpop.eup %2892 }
 0x801   : > { %2711 = vmatmul.mubr.msk.bf16.vlgmr.msra.gmra.mrb[36].mxu1 %vm1109_vm2, %v1749_v39  ;;  %v1690_v41 = vmul.f32 %v2893_v40, %v2889_v30  ;;  %v2904_v39 = vld [vmem:[%s3121_s29] sm:$0xff]  ;;  %s2909_s29 = sshll.u32 %s2982_s20, 4  ;;  %s2910_s29 = int_to_ptr.vmem [resolvable:$false] %s2909_s29 }
 0x802   : > { %2715 = vmatpush3.bf16.msra.mxu1 %v1756_v7  ;;  %2716 = vmatprep.mubr.msk.bf16.mxu1 %vm2970_vm1, %v2969_v2  ;;  %s2911_s2 = scalar_lea.vmem %s2910_s29, 256  ;;  %p2912_p0 = scmp.lt.s32.totalorder %s3446_s28, %s2910_s29 }
 0x803   : > { %2732 = vmatprep.subr.bf16.mxu1 %v2969_v2  ;;  %v1691_v43 = vpack.c.bf16 %v1690_v41, %v1690_v41  ;;  %p2913_p1 = scmp.lt.s32.totalorder %s2911_s2, %s2905_s23 }
 0x805   : > { %p2914_p2 = por %p2913_p1, %p2912_p0 }
 0x807   : > { %p2915_p3 = pnand %p2914_p2, %p2908_p13 }
 0x80d   : > { %2717 = vmatmul.mubr.msk.bf16.vlgmr.msra.gmra.mrb[36].mxu1 %vm1109_vm2, %v1691_v43 }
 0x80e   : > { %2733 = vmatpush3.bf16.xpose.msra.mxu1 %v1956_v44  ;;  %2734 = vmatprep.mubr.msk.bf16.mxu1 %vm2970_vm1, %v2969_v2 }
 0x80f   : > { %2750 = vmatprep.subr.bf16.mxu1 %v2969_v2 }
 0x815   : > { %2735 = vmatmul.mubr.msk.bf16.vlgmr.msra.gmra.mrb[40].mxu1 %vm1109_vm2, %v1891_v45 }
 0x816   : > { %2752 = vmatprep.mubr.msk.bf16.mxu1 %vm2970_vm1, %v2969_v2  ;;  %2751 = vmatpush3.bf16.msra.mxu1 %v2108_v23 }
 0x817   : > { %2756 = vmatprep.subr.bf16.mxu1 %v2969_v2 }
 0x8e0   : > { %v1835_v47 = vpop.f32.mrb[36].mxu1 }
 0x8e1   : > { %v1842_v48 = vpack.c.bf16 %v1835_v47, %v1835_v47  ;;  %v2718_v49 = vpop.f32.mrb[37].mxu1 }
 0x8e2   : > { %v1838_v50 = vpop.f32.mrb[38].mxu1  ;;  %v2862_v49 = vld [vmem:[%s3499_s12] sm:$0xff]  }
 0x8e3   : > { %v2719_v52 = vpop.f32.mrb[39].mxu1  ;;  %2723 = vmatmul.mubr.msk.bf16.vlgmr.msra.gmra.mrb[40].mxu0 %vm1109_vm2, %v1842_v48  ;;  %v2863_v50 = vld [vmem:[%s3499_s12 + $0x8] sm:$0xff]  }
 0x8e4   : > { %2727 = vmatpush3.bf16.xpose.msra.mxu0 %v1898_v51  ;;  %2728 = vmatprep.mubr.msk.bf16.mxu0 %vm2970_vm1, %v2969_v2  ;;  %v2864_v51 = vld [vmem:[%s3501_s14] sm:$0xff]   ;;  %v2865_v52 = vld [vmem:[%s3501_s14 + $0x8] sm:$0xff]  }
 0x8e5   : > { %2738 = vmatprep.subr.bf16.mxu0 %v2969_v2 }
 0x8e8   : > { %v1992_v53 = vpop.f32.mrb[40].mxu1 }
 0x8e9   : > { %v1998_v54 = vmul.f32 0.35355338, %v1992_v53  ;;  %v2736_v55 = vpop.f32.mrb[41].mxu1  ;;  %v2866_v53 = vld [vmem:[%s3501_s14 + $0x10] sm:$0xff]  }
 0x8ea   : > { %v1995_v56 = vpop.f32.mrb[42].mxu1 }
 0x8eb   : > { %2729 = vmatmul.mubr.msk.bf16.vlgmr.msra.gmra.mrb[44].mxu0 %vm1109_vm2, %v1891_v45  ;;  %v2737_v57 = vpop.f32.mrb[43].mxu1  ;;  %v1999_v58 = vsel %vm1109_vm2, %v1998_v54, -inf }
 0x8ec   : > { %2000 = vmax.xlane.f32.xlu0 %v1999_v58  ;;  %2740 = vmatprep.mubr.msk.bf16.mxu0 %vm2970_vm1, %v2969_v2  ;;  %v2473_v58 = vld [vmem:[%s3490_s3] ss:$0 sm:$0xff] }
 0x979   : > { %v2001_v59 = vpop.xlane.xlu0 %2000 }
 0x97a   : > { %v2002_v60 = vsub.f32 %v1998_v54, %v2001_v59 }
 0x97c   : > { %v2003_v61 = vmul.f32 1.442695, %v2002_v60  ;;  %v2474_v60 = vld [vmem:[%s3491_s4] ss:$0 sm:$0xff] }
 0x97e   : > { %2894 = vpow2.f32 %v2003_v61 }
 0x988   : > { %v2895_v62 = vpop.eup %2894 }
 0x989   : > { %v2005_v63 = vsel %vm1109_vm2, %v2895_v62, 0.0 }
 0x98a   : > { %2006 = vadd.xlane.f32.xlu0 %v2005_v63 }
 0x9b6   : > { %v1883_v0 = vpop.f32.mrb[40].mxu0 }
 0x9b7   : > { %v1889_v1 = vadd.f32 %v1883_v0, %v3344_v13  ;;  %v2724_v3 = vpop.f32.mrb[41].mxu0  ;;  %v2475_v0 = vld [vmem:[%s3500_s13] ss:$0 sm:$0xff] }
 0x9b8   : > { %v1886_v4 = vpop.f32.mrb[42].mxu0 }
 0x9b9   : > { %v2725_v5 = vpop.f32.mrb[43].mxu0 }
 0x9be   : > { %v1934_v6 = vpop.f32.mrb[44].mxu0 }
 0x9bf   : > { %v1940_v7 = vmul.f32 0.35355338, %v1934_v6  ;;  %v2730_v8 = vpop.f32.mrb[45].mxu0 }
 0x9c0   : > { %v1937_v9 = vpop.f32.mrb[46].mxu0  ;;  %v2479_v8 = vld [vmem:[%s3502_s15] ss:$0 sm:$0xff] }
 0x9c1   : > { %v2731_v10 = vpop.f32.mrb[47].mxu0  ;;  %v1941_v11 = vsel %vm1109_vm2, %v1940_v7, -inf }
 0x9c2   : > { %1942 = vmax.xlane.f32.xlu1 %v1941_v11 }
 0x9d3   : > { %2011 = vrot.lane.b32.xlu1 %v3247_v19, %s2981_s27  ;;  %s2486_s27 = sshll.u32 %s3089_s25, 7  ;;  %s2343_s25 = scalar_lea.sflag [#allocation4], %s510_s19 }
 0x9d4   : > { %s3444_s1 = scalar_lea.hbm %s3503_s16, %s2486_s27 }
 0xa17   : > { %v2007_v12 = vpop.xlane.xlu0 %2006 }
 0xa18   : > { %2896 = vrcp.f32 %v2007_v12 }
 0xa22   : > { %v2897_v14 = vpop.eup %2896 }
 0xa23   : > { %v2009_v13 = vmul.f32 %v2897_v14, %v2895_v62 }
 0xa25   : > { %v2010_v20 = vpack.c.bf16 %v2009_v13, %v2009_v13 }
 0xa4f   : > { %v1943_v15 = vpop.xlane.xlu1 %1942 }
 0xa50   : > { %v1944_v16 = vsub.f32 %v1940_v7, %v1943_v15 }
 0xa52   : > { %v1945_v17 = vmul.f32 1.442695, %v1944_v16 }
 0xa53   : > { %v2012_v18 = vpop.permute.xlu1 %2011 }
 0xa54   : > { %2898 = vpow2.f32 %v1945_v17  ;;  %v2017_v31 = vsel %vm1233_vm3, %v2012_v18, 0 }
 0xa55   : > { %2739 = vmatpush3.bf16.msra.mxu0 %v2017_v31 }
 0xa56   : > { %2744 = vmatprep.subr.bf16.mxu0 %v2969_v2 }
 0xa58   : > { %2741 = vmatmul.mubr.msk.bf16.vlgmr.msra.gmra.mrb[48].mxu0 %vm1109_vm2, %v2010_v20 }
 0xa59   : > { %2745 = vmatpush3.bf16.msra.mxu0 %v2017_v31  ;;  %2746 = vmatprep.mubr.msk.bf16.mxu0 %vm2970_vm1, %v2969_v2 }
 0xa5a   : > { %2764 = vmatprep.subr.bf16.mxu0 %v2969_v2 }
 0xa5e   : > { %v2899_v19 = vpop.eup %2898 }
 0xa5f   : > { %v1947_v21 = vsel %vm1109_vm2, %v2899_v19, 0.0 }
 0xa60   : > { %1948 = vadd.xlane.f32.xlu0 %v1947_v21 }
 0xaed   : > { %v1949_v24 = vpop.xlane.xlu0 %1948 }
 0xaee   : > { %2900 = vrcp.f32 %v1949_v24 }
 0xaf8   : > { %v2901_v25 = vpop.eup %2900 }
 0xaf9   : > { %v1951_v26 = vmul.f32 %v2901_v25, %v2899_v19 }
 0xafb   : > { %v1952_v27 = vpack.c.bf16 %v1951_v26, %v1951_v26 }
 0xafd   : > { %2747 = vmatmul.mubr.msk.bf16.vlgmr.msra.gmra.mrb[48].mxu0 %vm1109_vm2, %v1952_v27 }
 0xafe   : > { %2772 = vmatprep.mubr.msk.bf16.mxu0 %vm2970_vm1, %v2969_v2  ;;  %2765 = vmatpush3.bf16.msra.mxu0 %v2864_v51 }
 0xaff   : > { %2766 = vmatprep.subr.bf16.mxu0 %v2969_v2 }
 0xb02   : > { %2767 = vmatpush3.bf16.msra.mxu0 %v2865_v52 }
 0xb03   : > { %2768 = vmatprep.subr.bf16.mxu0 %v2969_v2 }
 0xb06   : > { %2769 = vmatpush3.bf16.msra.mxu0 %v2866_v53 }
 0xb07   : > { %2770 = vmatprep.subr.bf16.mxu0 %v2969_v2 }
 0xbd0   : > { %v2096_v28 = vpop.f32.mrb[48].mxu0 }
 0xbd1   : > { %v2103_v29 = vpack.c.bf16 %v2096_v28, %v2096_v28  ;;  %v2748_v30 = vpop.f32.mrb[49].mxu0 }
 0xbd2   : > { %v2099_v32 = vpop.f32.mrb[50].mxu0 }
 0xbd3   : > { %v2749_v33 = vpop.f32.mrb[51].mxu0  ;;  %2753 = vmatmul.mubr.msk.bf16.vlgmr.msra.gmra.mrb[44].mxu1 %vm1109_vm2, %v2103_v29 }
 0xbd4   : > { %2760 = vmatprep.mubr.msk.bf16.mxu1 %vm2970_vm1, %v2969_v2  ;;  %2757 = vmatpush3.bf16.msra.mxu1 %v2862_v49 }
 0xbd5   : > { %2758 = vmatprep.subr.bf16.mxu1 %v2969_v2  ;;  %v2867_v2 = vld [vmem:[%s3501_s14 + $0x18] sm:$0xff]  }
 0xbd6   : > { %2771 = vmatpush3.bf16.msra.mxu0 %v2867_v2 }
 0xbd8   : > { %2759 = vmatpush3.bf16.msra.mxu1 %v2863_v50 }
 0xca6   : > { %v2144_v34 = vpop.f32.mrb[44].mxu1 }
 0xca7   : > { %v2150_v35 = vadd.f32 %v2144_v34, %v1889_v1  ;;  %v2754_v36 = vpop.f32.mrb[45].mxu1 }
 0xca8   : > { %v2147_v38 = vpop.f32.mrb[46].mxu1 }
 0xca9   : > { %v2151_v40 = vadd.f32 %v2904_v39, %v2150_v35  ;;  %v2755_v41 = vpop.f32.mrb[47].mxu1 }
 0xcab   : > { %v2159_v42 = vadd.f32 %v2472_v37, %v2151_v40 }
 0xcad   : > { %v2160_v43 = vsel %vm519_vm0, %v2159_v42, 0.0 }
 0xcae   : > { %2161 = vadd.xlane.f32.xlu0 %v2160_v43 }
 0xd3b   : > { %v2162_v44 = vpop.xlane.xlu0 %2161 }
 0xd3c   : > { %v2163_v45 = vmul.f32 0.03125, %v2162_v44 }
 0xd3e   : > { %v2164_v46 = vsub.f32 %v2159_v42, %v2163_v45 }
 0xd40   : > { %v2165_v47 = vmul.f32 %v2164_v46, %v2164_v46 }
 0xd42   : > { %v2166_v48 = vsel %vm519_vm0, %v2165_v47, 0.0 }
 0xd43   : > { %2167 = vadd.xlane.f32.xlu0 %v2166_v48 }
 0xdd0   : > { %v2168_v54 = vpop.xlane.xlu0 %2167 }
 0xdd1   : > { %v2169_v55 = vmul.f32 0.03125, %v2168_v54 }
 0xdd3   : > { %v2170_v56 = vadd.f32 1e-05, %v2169_v55 }
 0xdd5   : > { %2902 = vrsqrt.f32 %v2170_v56 }
 0xddf   : > { %v2903_v57 = vpop.eup %2902 }
 0xde0   : > { %v2172_v59 = vmul.f32 %v2903_v57, %v2164_v46 }
 0xde2   : > { %v2180_v61 = vmul.f32 %v2473_v58, %v2172_v59 }
 0xde4   : > { %v2188_v62 = vadd.f32 %v2474_v60, %v2180_v61 }
 0xde6   : > { %v2193_v63 = vpack.c.bf16 %v2188_v62, %v2188_v62 }
 0xde8   : > { %2761 = vmatmul.mubr.msk.bf16.vlgmr.msra.gmra.mrb[48].mxu1 %vm519_vm0, %v2193_v63 }
 0xebb   : > { %v2250_v1 = vpop.f32.mrb[48].mxu1 }
 0xebc   : > { %v2251_v3 = vadd.f32 %v2475_v0, %v2250_v1  ;;  %v2762_v4 = vpop.f32.mrb[49].mxu1 }
 0xebd   : > { %v2253_v5 = vpop.f32.mrb[50].mxu1 }
 0xebe   : > { %v2264_v6 = vpack.c.bf16 %v2251_v3, %v2251_v3  ;;  %v2763_v7 = vpop.f32.mrb[51].mxu1 }
 0xec0   : > { %2773 = vmatmul.mubr.msk.bf16.vlgmr.msra.gmra.mrb[52].mxu0 %vm2296_vm4, %v2264_v6 }
 0xf93   : > { %v2334_v9 = vpop.f32.mrb[52].mxu0 }
 0xf94   : > { %v2335_v10 = vadd.f32 %v2479_v8, %v2334_v9  ;;  %v2774_v11 = vpop.f32.mrb[53].mxu0 }
 0xf95   : > { %v2337_v12 = vpop.f32.mrb[54].mxu0 }
 0xf96   : > { %v2340_v14 = vadd.f32 %v2335_v10, %v2159_v42  ;;  %v2775_v15 = vpop.f32.mrb[55].mxu0 }
 0xf98   : > { %2341 = vst.msk [vmem:[%s512_s26] sm:$0xff] %vm519_vm0, %v2340_v14 }
 0xf99   : > { %2918 = shalt.err (!%p2915_p3)
}
 0xf9a   : > { %s2919_s19 = scalar_lea.hbm %s3444_s1, 128  ;;  %s2923_s18 = scalar_lea.hbm %s3503_s16, 256 }
 0xf9b   : > { %p2920_p4 = scmp.ne.s32.totalorder %s3444_s1, %s2919_s19  ;;  %p2924_p9 = scmp.lt.u32.totalorder %s3444_s1, %s3503_s16 }
 0xf9c   : > { %p2925_p10 = scmp.lt.u32.totalorder %s2923_s18, %s2919_s19  ;;  %p2927_p12 = scmp.lt.u32.totalorder %s2919_s19, %s3444_s1 }
 0xf9d   : > { %p2921_p7 = pnand %p2920_p4, %p3106_p5 }
 0xf9e   : > { %p2926_p11 = por %p2925_p10, %p2924_p9 }
 0xf9f   : > { %p2922_p8 = pneg %p2921_p7 }
 0xfa0   : > { %p2928_p13 = por %p2927_p12, %p2926_p11 }
 0xfa2   : > { %p2929_p0 = pnand %p2928_p13, %p2922_p8 }
 0xfa4   : > { %2932 = shalt.err (!%p2929_p0)
}
 0xfa5   : > { %2792 = dma.vmem_to_hbm [thread:$0]  (%p3106_p5), %s3446_s28, 128, %s3444_s1, %s2343_s25  }
 0xfa6 PF: > { %p2798_p1 = scmp.ge.s32.totalorder %s2967_s24, 2  ;;  %s2368_s2 = sand.u32 1, %s2955_s21  }
 0xfa7   : > { %s2369_s23 = scalar_lea.sflag [#allocation4], %s2368_s2 }
 0xfa8   : > { %p2795_p2 = pnand %p2798_p1, %p3110_p6 }
 0xfaa   : > { %2950 = dma.done.wait (!%p2795_p2), %s2369_s23, 128  }
 0xfab   : > { %2952 = vsyncadd (!%p2795_p2), %s2369_s23, 4294967168  ;;  %s3518_s24 = sld [smem:[#allocation7_spill]]  ;;  %s3519_s29 = sld [smem:[#allocation6_spill]] }
 0xfac   : > { %s3520_s23 = sld [smem:[#allocation8_spill]]  ;;  %s3521_s21 = smov %s2959_s22 }
 0xfb1   : > { %p26_p3 = scmp.ge.s32.totalorder %s3518_s24, 4   ;;  %s3522_s22 = smov %s3519_s29 }
 0xfb3   :  { %28 = sbr.rel (!%p26_p3) target bundleno = 7 (0x7), region = 119 }
 0xfba   :  { %2374 = vsyncpa [#allocation4], 1 }
 0xfbb   :  { %2376 = vsyncpa [#allocation4 + $0x1], 1 }

</bundles_post_ra>
